<compile_context>
chip_gen: v7x
topology: tpu7x:2x2x1
jax: 0.10.0
libtpu: 0.0.40
codegen_flags: <defaults>
</compile_context>

<pallas_src>
import jax
import jax.numpy as jnp
from jax import lax
from jax.experimental import pallas as pl
from jax.experimental.pallas import tpu as pltpu


# ----------------------------------------------------------------------------
# Fused kernel: conv3x3 + InstanceNorm + ReLU + ECA gate, one batch element/step
# ----------------------------------------------------------------------------
def _make_kernel(Ppad, L, Wp2, inv_n, pad_count, Cin, use_im2col):
    def kernel(xext_ref, w_ref, gam_ref, bet_ref, ecam_ref, mask_ref, out_ref,
               *scratch):
        # xext_ref : (1, Cin, PE)      zero-extended flat padded upsampled input
        # w_ref    : (Cout, 9*Cin)     merged conv weight   [im2col path]
        #            (9, Cout, Cin)    tap-major conv weight [fallback path]
        # gam_ref  : (Cout, 1)         InstanceNorm gamma
        # bet_ref  : (Cout, 1)         InstanceNorm beta
        # ecam_ref : (Cout, Cout)      ECA band matrix (1-D conv over channels)
        # mask_ref : (1, Ppad)         1.0 at valid output lanes, 0.0 at padding
        # out_ref  : (1, Cout, Ppad)
        # scratch  : optional VMEM (9*Cin, Ppad) im2col slab

        # ---- 3x3 conv over the flattened padded upsampled frame (MXU) ----
        if use_im2col:
            im2col_ref, = scratch
            for kh in range(3):
                for kw in range(3):
                    t = kh * 3 + kw
                    d = (kh - 1) * Wp2 + (kw - 1)
                    # ref-view slice -> direct VMEM load, no value-level relayout
                    im2col_ref[t * Cin:(t + 1) * Cin, :] = (
                        xext_ref[0, :, L + d:L + d + Ppad])
            acc = jnp.dot(w_ref[...], im2col_ref[...],
                          preferred_element_type=jnp.float32)       # (Cout, Ppad)
        else:
            acc = None
            for kh in range(3):
                for kw in range(3):
                    t = kh * 3 + kw
                    d = (kh - 1) * Wp2 + (kw - 1)
                    tap = xext_ref[0, :, L + d:L + d + Ppad]          # (Cin, Ppad)
                    c = jnp.dot(w_ref[t], tap,
                                preferred_element_type=jnp.float32)
                    acc = c if acc is None else acc + c
        # conv bias intentionally omitted: it cancels exactly under InstanceNorm.

        # ---- InstanceNorm2d (affine, eps=1e-5) over valid lanes, then ReLU ----
        mask = mask_ref[...]                                          # (1, Ppad)
        mean = jnp.sum(acc * mask, axis=1, keepdims=True) * inv_n     # (Cout, 1)
        centm = (acc - mean) * mask                                   # masked deviations
        var = jnp.sum(centm * centm, axis=1, keepdims=True) * inv_n
        beta = bet_ref[...]
        y = centm * lax.rsqrt(var + 1e-5) * gam_ref[...] + beta       # pad lanes == beta
        y = jnp.maximum(y, 0.0)                                       # pad lanes == max(beta,0)

        # ---- ECA: pool-first -> tiny band conv over channels -> exact sigmoid ----
        # sum over valid lanes = sum over all lanes - pad_count * max(beta, 0)
        pooled = (jnp.sum(y, axis=1, keepdims=True)
                  - pad_count * jnp.maximum(beta, 0.0)) * inv_n       # (Cout, 1)
        gate_pre = jnp.dot(ecam_ref[...], pooled,
                           preferred_element_type=jnp.float32)        # (Cout, 1)
        gate = pl.reciprocal(1.0 + jnp.exp(-gate_pre), approx=False)  # exact sigmoid
        out_ref[0] = (y * gate).astype(out_ref.dtype)
    return kernel


# ----------------------------------------------------------------------------
# Wrapper
# ----------------------------------------------------------------------------
def up_block_2d_eca(x, params, *, compute_dtype=jnp.bfloat16):
    """Forward pass of UpBlock2dECA. x: (B, Cin, H, W) float32, NCHW layout.

    `params["b"]` (conv bias) is accepted but unused: it cancels exactly under
    the InstanceNorm that follows the conv.
    """
    w = params["w"]                      # (Cout, Cin, 3, 3)
    gamma, beta = params["gamma"], params["beta"]
    eca_w = params["eca_w"]              # (3,)  Conv1d(1,1,3,bias=False) weight

    B, Cin, H, W = x.shape
    Cout = w.shape[0]
    Hu, Wu = 2 * H, 2 * W                # nearest-neighbour upsample x2
    Hp2, Wp2 = Hu + 2, Wu + 2            # +1 zero pad each side for the 3x3 conv
    P = Hp2 * Wp2                        # flat padded spatial size
    Ppad = ((P + 127) // 128) * 128      # lane-dense output width
    L = Wp2 + 1                          # max |flat tap shift|
    PE = ((2 * L + Ppad + 127) // 128) * 128
    inv_n = 1.0 / float(Hu * Wu)
    pad_count = float(Ppad - Hu * Wu)    # lanes outside the valid Hu x Wu region

    itemsize = jnp.dtype(compute_dtype).itemsize

    # --- layout glue (pure JAX): upsample, pad, flatten, zero-extend ---
    # TODO(synk): replace this wrapper-side nearest 2x upsample with the polyphase
    # decomposition (4 parity-interleaved <=2x2-tap convs on the original-resolution
    # image) to remove the remaining ~2x (bf16) input HBM inflation and ~2.25x MACs.
    xu = jnp.repeat(jnp.repeat(x, 2, axis=2), 2, axis=3)            # (B, Cin, Hu, Wu)
    xp = jnp.pad(xu, ((0, 0), (0, 0), (1, 1), (1, 1)))              # (B, Cin, Hp2, Wp2)
    xflat = xp.reshape(B, Cin, P)
    xext = jnp.pad(xflat, ((0, 0), (0, 0), (L, PE - L - P))).astype(compute_dtype)

    # Merged im2col path for small Cin (one K=9*Cin matmul); keep packed-row
    # alignment trivial by requiring even Cin when the slab is bf16.
    use_im2col = (Cin <= 32) and (Cin % 2 == 0 or itemsize == 4)
    if use_im2col:
        # (Cout, 9*Cin): column index = (kh*3+kw)*Cin + cin -> matches slab rows
        w_arg = jnp.transpose(w, (0, 2, 3, 1)).reshape(Cout, 9 * Cin).astype(compute_dtype)
        w_spec = pl.BlockSpec((Cout, 9 * Cin), lambda b: (0, 0))
        scratch_shapes = [pltpu.VMEM((9 * Cin, Ppad), compute_dtype)]
    else:
        # tap-major: w_taps[kh*3+kw] = w[:, :, kh, kw]
        w_arg = jnp.transpose(w, (2, 3, 0, 1)).reshape(9, Cout, Cin).astype(compute_dtype)
        w_spec = pl.BlockSpec((9, Cout, Cin), lambda b: (0, 0, 0))
        scratch_shapes = []

    # Validity mask for the flattened padded frame (1 = real output pixel).
    # Kept as a tiny HBM input: generating it in-kernel needs vector s32 div/mod,
    # which is riskier to lower than this one small DMA is worth.
    rr = jnp.arange(Hp2)[:, None]
    cc = jnp.arange(Wp2)[None, :]
    valid = (rr >= 1) & (rr <= Hu) & (cc >= 1) & (cc <= Wu)
    mask = jnp.pad(valid.reshape(1, P).astype(jnp.float32), ((0, 0), (0, Ppad - P)))

    # ECA 1-D conv (k=3, pad=1, no bias) over channels as a band matrix
    ci = jnp.arange(Cout)[:, None]
    cj = jnp.arange(Cout)[None, :]
    eca_m = (eca_w[0] * (cj == ci - 1).astype(jnp.float32)
             + eca_w[1] * (cj == ci).astype(jnp.float32)
             + eca_w[2] * (cj == ci + 1).astype(jnp.float32))       # (Cout, Cout)

    kernel = _make_kernel(Ppad, L, Wp2, inv_n, pad_count, Cin, use_im2col)

    # Explicit VMEM budget (double-buffered blocks + scratch + f32 temporaries),
    # clamped so it is valid on v7x's 64 MiB per-core VMEM.
    vmem_est = (2 * Cin * PE * itemsize + 2 * Cout * Ppad * 4
                + (9 * Cin * Ppad * itemsize if use_im2col else 0)
                + 6 * Cout * Ppad * 4
                + (9 * Cout * Cin + Cout * Cout + 2 * Cout + Ppad) * 4)
    vmem_limit = int(min(64 * 1024 * 1024, max(2 * vmem_est, 32 * 1024 * 1024)))

    # TODO(synk): for large Cout / spatial shapes add a Cout (or spatial) grid axis
    # so blocks + temporaries fit v7x's 64 MiB VMEM and both of its TensorCores stay
    # busy at batch<=2; the pooled ECA vector then needs a tiny cross-tile accumulator.
    out_flat = pl.pallas_call(
        kernel,
        out_shape=jax.ShapeDtypeStruct((B, Cout, Ppad), jnp.float32),
        grid=(B,),
        in_specs=[
            pl.BlockSpec((1, Cin, PE), lambda b: (b, 0, 0)),
            w_spec,
            pl.BlockSpec((Cout, 1), lambda b: (0, 0)),
            pl.BlockSpec((Cout, 1), lambda b: (0, 0)),
            pl.BlockSpec((Cout, Cout), lambda b: (0, 0)),
            pl.BlockSpec((1, Ppad), lambda b: (0, 0)),
        ],
        out_specs=pl.BlockSpec((1, Cout, Ppad), lambda b: (b, 0, 0)),
        scratch_shapes=scratch_shapes,
        compiler_params=pltpu.CompilerParams(
            dimension_semantics=("parallel",),
            vmem_limit_bytes=vmem_limit),
    )(xext, w_arg, gamma.reshape(Cout, 1).astype(jnp.float32),
      beta.reshape(Cout, 1).astype(jnp.float32), eca_m, mask)

    # TODO(synk): fuse this crop into the downstream consumer (it is one extra
    # read+write of the output); kept here so the function returns exact NCHW.
    out = out_flat[:, :, :P].reshape(B, Cout, Hp2, Wp2)[:, :, 1:Hu + 1, 1:Wu + 1]
    return out


# ----------------------------------------------------------------------------
# Pure-JAX reference mirroring the PyTorch module (for verification)
# ----------------------------------------------------------------------------
def reference(x, params):
    w, b = params["w"], params["b"]
    gamma, beta = params["gamma"], params["beta"]
    eca_w = params["eca_w"]

    xu = jnp.repeat(jnp.repeat(x, 2, axis=2), 2, axis=3)    # F.interpolate, nearest x2
    y = lax.conv_general_dilated(xu, w, (1, 1), ((1, 1), (1, 1)),
                                 dimension_numbers=("NCHW", "OIHW", "NCHW"))
    y = y + b[None, :, None, None]
    mean = y.mean(axis=(2, 3), keepdims=True)
    var = ((y - mean) ** 2).mean(axis=(2, 3), keepdims=True)
    y = (y - mean) / jnp.sqrt(var + 1e-5)
    y = y * gamma[None, :, None, None] + beta[None, :, None, None]
    y = jnp.maximum(y, 0.0)

    # ECAAttention: global avg pool -> conv1d(k=3, pad=1) over channels -> sigmoid
    m = y.mean(axis=(2, 3))                                 # (B, Cout)
    mp = jnp.pad(m, ((0, 0), (1, 1)))
    g = eca_w[0] * mp[:, :-2] + eca_w[1] * mp[:, 1:-1] + eca_w[2] * mp[:, 2:]
    g = jax.nn.sigmoid(g)
    return y * g[:, :, None, None]


if __name__ == "__main__":
    B, Cin, Cout, H, W = 2, 4, 8, 16, 16
    key = jax.random.PRNGKey(0)
    ks = jax.random.split(key, 6)
    x = jax.random.normal(ks[0], (B, Cin, H, W), jnp.float32)
    params = dict(
        w=0.2 * jax.random.normal(ks[1], (Cout, Cin, 3, 3), jnp.float32),
        b=0.1 * jax.random.normal(ks[2], (Cout,), jnp.float32),
        gamma=1.0 + 0.1 * jax.random.normal(ks[3], (Cout,), jnp.float32),
        beta=0.1 * jax.random.normal(ks[4], (Cout,), jnp.float32),
        eca_w=0.5 * jax.random.normal(ks[5], (3,), jnp.float32),
    )

    ref = jax.block_until_ready(reference(x, params))

    # f32 matmul-operand path: tight tolerance
    out_f32 = jax.block_until_ready(
        up_block_2d_eca(x, params, compute_dtype=jnp.float32))
    assert out_f32.shape == (B, Cout, 2 * H, 2 * W), out_f32.shape
    err32 = float(jnp.max(jnp.abs(out_f32 - ref)))
    assert err32 < 2e-3, f"f32 path max abs error too large: {err32}"

    # default bf16 matmul-operand path (norm / ECA math stays f32): looser tolerance
    out_bf16 = jax.block_until_ready(up_block_2d_eca(x, params))
    assert out_bf16.shape == (B, Cout, 2 * H, 2 * W), out_bf16.shape
    errbf = float(jnp.max(jnp.abs(out_bf16 - ref)))
    assert errbf < 7.5e-2, f"bf16 path max abs error too large: {errbf}"

    print("KERNEL_OK")
</pallas_src>

<mosaic_0001>
module attributes {stable_mosaic.version = 11 : i64} {
  func.func @kernel(%arg0: i32, %arg1: memref<1x4x1408xf32, #tpu.memory_space<vmem>>, %arg2: memref<8x36xf32, #tpu.memory_space<vmem>>, %arg3: memref<8x1xf32, #tpu.memory_space<vmem>>, %arg4: memref<8x1xf32, #tpu.memory_space<vmem>>, %arg5: memref<8x8xf32, #tpu.memory_space<vmem>>, %arg6: memref<1x1280xf32, #tpu.memory_space<vmem>>, %arg7: memref<1x8x1280xf32, #tpu.memory_space<vmem>>, %arg8: memref<36x1280xf32, #tpu.memory_space<vmem>>) attributes {dimension_semantics = [#tpu.dimension_semantics<parallel>], iteration_bounds = array<i64: 2>, scalar_prefetch = 0 : i64, scratch_operands = 1 : i64, tpu.core_type = #tpu.core_type<tc>, window_params = [{transform_indices = @transform_0, window_bounds = array<i64: 1, 4, 1408>}, {pipeline_mode = #tpu.pipeline_mode<synchronous>, transform_indices = @transform_1, window_bounds = array<i64: 8, 36>}, {pipeline_mode = #tpu.pipeline_mode<synchronous>, transform_indices = @transform_2, window_bounds = array<i64: 8, 1>}, {pipeline_mode = #tpu.pipeline_mode<synchronous>, transform_indices = @transform_3, window_bounds = array<i64: 8, 1>}, {pipeline_mode = #tpu.pipeline_mode<synchronous>, transform_indices = @transform_4, window_bounds = array<i64: 8, 8>}, {pipeline_mode = #tpu.pipeline_mode<synchronous>, transform_indices = @transform_5, window_bounds = array<i64: 1, 1280>}, {transform_indices = @transform_6, window_bounds = array<i64: 1, 8, 1280>}]} {
    %c0 = arith.constant 0 : index
    %c0_0 = arith.constant 0 : index
    %c0_1 = arith.constant 0 : index
    %0 = vector.load %arg1[%c0, %c0_0, %c0_1] : memref<1x4x1408xf32, #tpu.memory_space<vmem>>, vector<1x4x1280xf32>
    %1 = vector.shape_cast %0 : vector<1x4x1280xf32> to vector<4x1280xf32>
    %c0_2 = arith.constant 0 : index
    %c0_3 = arith.constant 0 : index
    %2 = vector.load %arg8[%c0_2, %c0_3] : memref<36x1280xf32, #tpu.memory_space<vmem>>, vector<4x1280xf32>
    tpu.vector_store %arg8[%c0_2, %c0_3], %1 {strides = array<i32>} : memref<36x1280xf32, #tpu.memory_space<vmem>>, vector<4x1280xf32>,
    %c0_4 = arith.constant 0 : index
    %c0_5 = arith.constant 0 : index
    %c1 = arith.constant 1 : index
    %3 = vector.load %arg1[%c0_4, %c0_5, %c1] : memref<1x4x1408xf32, #tpu.memory_space<vmem>>, vector<1x4x1280xf32>
    %4 = vector.shape_cast %3 : vector<1x4x1280xf32> to vector<4x1280xf32>
    %c4 = arith.constant 4 : index
    %c0_6 = arith.constant 0 : index
    %5 = vector.load %arg8[%c4, %c0_6] : memref<36x1280xf32, #tpu.memory_space<vmem>>, vector<4x1280xf32>
    tpu.vector_store %arg8[%c4, %c0_6], %4 {strides = array<i32>} : memref<36x1280xf32, #tpu.memory_space<vmem>>, vector<4x1280xf32>,
    %c0_7 = arith.constant 0 : index
    %c0_8 = arith.constant 0 : index
    %c2 = arith.constant 2 : index
    %6 = vector.load %arg1[%c0_7, %c0_8, %c2] : memref<1x4x1408xf32, #tpu.memory_space<vmem>>, vector<1x4x1280xf32>
    %7 = vector.shape_cast %6 : vector<1x4x1280xf32> to vector<4x1280xf32>
    %c8 = arith.constant 8 : index
    %c0_9 = arith.constant 0 : index
    %8 = vector.load %arg8[%c8, %c0_9] : memref<36x1280xf32, #tpu.memory_space<vmem>>, vector<4x1280xf32>
    tpu.vector_store %arg8[%c8, %c0_9], %7 {strides = array<i32>} : memref<36x1280xf32, #tpu.memory_space<vmem>>, vector<4x1280xf32>,
    %c0_10 = arith.constant 0 : index
    %c0_11 = arith.constant 0 : index
    %c34 = arith.constant 34 : index
    %9 = vector.load %arg1[%c0_10, %c0_11, %c34] : memref<1x4x1408xf32, #tpu.memory_space<vmem>>, vector<1x4x1280xf32>
    %10 = vector.shape_cast %9 : vector<1x4x1280xf32> to vector<4x1280xf32>
    %c12 = arith.constant 12 : index
    %c0_12 = arith.constant 0 : index
    %11 = vector.load %arg8[%c12, %c0_12] : memref<36x1280xf32, #tpu.memory_space<vmem>>, vector<4x1280xf32>
    tpu.vector_store %arg8[%c12, %c0_12], %10 {strides = array<i32>} : memref<36x1280xf32, #tpu.memory_space<vmem>>, vector<4x1280xf32>,
    %c0_13 = arith.constant 0 : index
    %c0_14 = arith.constant 0 : index
    %c35 = arith.constant 35 : index
    %12 = vector.load %arg1[%c0_13, %c0_14, %c35] : memref<1x4x1408xf32, #tpu.memory_space<vmem>>, vector<1x4x1280xf32>
    %13 = vector.shape_cast %12 : vector<1x4x1280xf32> to vector<4x1280xf32>
    %c16 = arith.constant 16 : index
    %c0_15 = arith.constant 0 : index
    %14 = vector.load %arg8[%c16, %c0_15] : memref<36x1280xf32, #tpu.memory_space<vmem>>, vector<4x1280xf32>
    tpu.vector_store %arg8[%c16, %c0_15], %13 {strides = array<i32>} : memref<36x1280xf32, #tpu.memory_space<vmem>>, vector<4x1280xf32>,
    %c0_16 = arith.constant 0 : index
    %c0_17 = arith.constant 0 : index
    %c36 = arith.constant 36 : index
    %15 = vector.load %arg1[%c0_16, %c0_17, %c36] : memref<1x4x1408xf32, #tpu.memory_space<vmem>>, vector<1x4x1280xf32>
    %16 = vector.shape_cast %15 : vector<1x4x1280xf32> to vector<4x1280xf32>
    %c20 = arith.constant 20 : index
    %c0_18 = arith.constant 0 : index
    %17 = vector.load %arg8[%c20, %c0_18] : memref<36x1280xf32, #tpu.memory_space<vmem>>, vector<4x1280xf32>
    tpu.vector_store %arg8[%c20, %c0_18], %16 {strides = array<i32>} : memref<36x1280xf32, #tpu.memory_space<vmem>>, vector<4x1280xf32>,
    %c0_19 = arith.constant 0 : index
    %c0_20 = arith.constant 0 : index
    %c68 = arith.constant 68 : index
    %18 = vector.load %arg1[%c0_19, %c0_20, %c68] : memref<1x4x1408xf32, #tpu.memory_space<vmem>>, vector<1x4x1280xf32>
    %19 = vector.shape_cast %18 : vector<1x4x1280xf32> to vector<4x1280xf32>
    %c24 = arith.constant 24 : index
    %c0_21 = arith.constant 0 : index
    %20 = vector.load %arg8[%c24, %c0_21] : memref<36x1280xf32, #tpu.memory_space<vmem>>, vector<4x1280xf32>
    tpu.vector_store %arg8[%c24, %c0_21], %19 {strides = array<i32>} : memref<36x1280xf32, #tpu.memory_space<vmem>>, vector<4x1280xf32>,
    %c0_22 = arith.constant 0 : index
    %c0_23 = arith.constant 0 : index
    %c69 = arith.constant 69 : index
    %21 = vector.load %arg1[%c0_22, %c0_23, %c69] : memref<1x4x1408xf32, #tpu.memory_space<vmem>>, vector<1x4x1280xf32>
    %22 = vector.shape_cast %21 : vector<1x4x1280xf32> to vector<4x1280xf32>
    %c28 = arith.constant 28 : index
    %c0_24 = arith.constant 0 : index
    %23 = vector.load %arg8[%c28, %c0_24] : memref<36x1280xf32, #tpu.memory_space<vmem>>, vector<4x1280xf32>
    tpu.vector_store %arg8[%c28, %c0_24], %22 {strides = array<i32>} : memref<36x1280xf32, #tpu.memory_space<vmem>>, vector<4x1280xf32>,
    %c0_25 = arith.constant 0 : index
    %c0_26 = arith.constant 0 : index
    %c70 = arith.constant 70 : index
    %24 = vector.load %arg1[%c0_25, %c0_26, %c70] : memref<1x4x1408xf32, #tpu.memory_space<vmem>>, vector<1x4x1280xf32>
    %25 = vector.shape_cast %24 : vector<1x4x1280xf32> to vector<4x1280xf32>
    %c32 = arith.constant 32 : index
    %c0_27 = arith.constant 0 : index
    %26 = vector.load %arg8[%c32, %c0_27] : memref<36x1280xf32, #tpu.memory_space<vmem>>, vector<4x1280xf32>
    tpu.vector_store %arg8[%c32, %c0_27], %25 {strides = array<i32>} : memref<36x1280xf32, #tpu.memory_space<vmem>>, vector<4x1280xf32>,
    %c0_28 = arith.constant 0 : index
    %c0_29 = arith.constant 0 : index
    %27 = vector.load %arg2[%c0_28, %c0_29] : memref<8x36xf32, #tpu.memory_space<vmem>>, vector<8x36xf32>
    %c0_30 = arith.constant 0 : index
    %c0_31 = arith.constant 0 : index
    %28 = vector.load %arg8[%c0_30, %c0_31] : memref<36x1280xf32, #tpu.memory_space<vmem>>, vector<36x1280xf32>
    %cst = arith.constant dense<0.000000e+00> : vector<8x1280xf32>
    %29 = tpu.matmul %27, %28, %cst {dimension_numbers = #tpu.dot_dimension_numbers<[1], [0], [0], [1], [0, 0, 1, 1], [], []>} : vector<8x36xf32>, vector<36x1280xf32>, vector<8x1280xf32> -> vector<8x1280xf32>
    %c0_32 = arith.constant 0 : index
    %c0_33 = arith.constant 0 : index
    %30 = vector.load %arg6[%c0_32, %c0_33] : memref<1x1280xf32, #tpu.memory_space<vmem>>, vector<1x1280xf32>
    %31 = vector.broadcast %30 : vector<1x1280xf32> to vector<8x1280xf32>
    %32 = arith.mulf %29, %31 : vector<8x1280xf32>
    %cst_34 = arith.constant dense<0.000000e+00> : vector<8xf32>
    %33 = vector.multi_reduction <add>, %32, %cst_34 [1] : vector<8x1280xf32> to vector<8xf32>
    %34 = vector.shape_cast %33 : vector<8xf32> to vector<8x1xf32>
    %cst_35 = arith.constant 9.765625E-4 : f32
    %35 = vector.broadcast %cst_35 : f32 to vector<8x1xf32>
    %36 = arith.mulf %34, %35 : vector<8x1xf32>
    %37 = vector.broadcast %36 : vector<8x1xf32> to vector<8x1280xf32>
    %38 = arith.subf %29, %37 : vector<8x1280xf32>
    %39 = vector.broadcast %30 : vector<1x1280xf32> to vector<8x1280xf32>
    %40 = arith.mulf %38, %39 : vector<8x1280xf32>
    %41 = arith.mulf %40, %40 : vector<8x1280xf32>
    %cst_36 = arith.constant dense<0.000000e+00> : vector<8xf32>
    %42 = vector.multi_reduction <add>, %41, %cst_36 [1] : vector<8x1280xf32> to vector<8xf32>
    %43 = vector.shape_cast %42 : vector<8xf32> to vector<8x1xf32>
    %cst_37 = arith.constant 9.765625E-4 : f32
    %44 = vector.broadcast %cst_37 : f32 to vector<8x1xf32>
    %45 = arith.mulf %43, %44 : vector<8x1xf32>
    %c0_38 = arith.constant 0 : index
    %c0_39 = arith.constant 0 : index
    %46 = vector.load %arg4[%c0_38, %c0_39] : memref<8x1xf32, #tpu.memory_space<vmem>>, vector<8x1xf32>
    %cst_40 = arith.constant 9.99999974E-6 : f32
    %47 = vector.broadcast %cst_40 : f32 to vector<8x1xf32>
    %48 = arith.addf %45, %47 : vector<8x1xf32>
    %49 = math.rsqrt %48 : vector<8x1xf32>
    %50 = vector.broadcast %49 : vector<8x1xf32> to vector<8x1280xf32>
    %51 = arith.mulf %40, %50 : vector<8x1280xf32>
    %c0_41 = arith.constant 0 : index
    %c0_42 = arith.constant 0 : index
    %52 = vector.load %arg3[%c0_41, %c0_42] : memref<8x1xf32, #tpu.memory_space<vmem>>, vector<8x1xf32>
    %53 = vector.broadcast %52 : vector<8x1xf32> to vector<8x1280xf32>
    %54 = arith.mulf %51, %53 : vector<8x1280xf32>
    %55 = vector.broadcast %46 : vector<8x1xf32> to vector<8x1280xf32>
    %56 = arith.addf %54, %55 : vector<8x1280xf32>
    %cst_43 = arith.constant 0.000000e+00 : f32
    %57 = vector.broadcast %cst_43 : f32 to vector<8x1280xf32>
    %58 = arith.maximumf %56, %57 : vector<8x1280xf32>
    %cst_44 = arith.constant dense<0.000000e+00> : vector<8xf32>
    %59 = vector.multi_reduction <add>, %58, %cst_44 [1] : vector<8x1280xf32> to vector<8xf32>
    %60 = vector.shape_cast %59 : vector<8xf32> to vector<8x1xf32>
    %cst_45 = arith.constant 0.000000e+00 : f32
    %61 = vector.broadcast %cst_45 : f32 to vector<8x1xf32>
    %62 = arith.maximumf %46, %61 : vector<8x1xf32>
    %cst_46 = arith.constant 2.560000e+02 : f32
    %63 = vector.broadcast %cst_46 : f32 to vector<8x1xf32>
    %64 = arith.mulf %63, %62 : vector<8x1xf32>
    %65 = arith.subf %60, %64 : vector<8x1xf32>
    %cst_47 = arith.constant 9.765625E-4 : f32
    %66 = vector.broadcast %cst_47 : f32 to vector<8x1xf32>
    %67 = arith.mulf %65, %66 : vector<8x1xf32>
    %c0_48 = arith.constant 0 : index
    %c0_49 = arith.constant 0 : index
    %68 = vector.load %arg5[%c0_48, %c0_49] : memref<8x8xf32, #tpu.memory_space<vmem>>, vector<8x8xf32>
    %cst_50 = arith.constant dense<0.000000e+00> : vector<8x1xf32>
    %69 = tpu.matmul %68, %67, %cst_50 {dimension_numbers = #tpu.dot_dimension_numbers<[1], [0], [0], [1], [0, 0, 1, 1], [], []>} : vector<8x8xf32>, vector<8x1xf32>, vector<8x1xf32> -> vector<8x1xf32>
    %cst_51 = arith.constant 0.000000e+00 : f32
    %70 = vector.broadcast %cst_51 : f32 to vector<8x1xf32>
    %71 = arith.subf %70, %69 : vector<8x1xf32>
    %72 = math.exp %71 : vector<8x1xf32>
    %cst_52 = arith.constant 1.000000e+00 : f32
    %73 = vector.broadcast %cst_52 : f32 to vector<8x1xf32>
    %74 = arith.addf %73, %72 : vector<8x1xf32>
    %75 = tpu.reciprocal %74 : vector<8x1xf32> -> vector<8x1xf32>
    %76 = vector.broadcast %75 : vector<8x1xf32> to vector<8x1280xf32>
    %77 = arith.mulf %58, %76 : vector<8x1280xf32>
    %c0_53 = arith.constant 0 : index
    %c0_54 = arith.constant 0 : index
    %c0_55 = arith.constant 0 : index
    %78 = vector.load %arg7[%c0_53, %c0_54, %c0_55] : memref<1x8x1280xf32, #tpu.memory_space<vmem>>, vector<1x8x1280xf32>
    %79 = vector.shape_cast %78 : vector<1x8x1280xf32> to vector<8x1280xf32>
    %80 = vector.shape_cast %77 : vector<8x1280xf32> to vector<1x8x1280xf32>
    tpu.vector_store %arg7[%c0_53, %c0_54, %c0_55], %80 {strides = array<i32>} : memref<1x8x1280xf32, #tpu.memory_space<vmem>>, vector<1x8x1280xf32>,
    return
  }
  func.func @transform_0(%arg0: i32) -> (i32, i32, i32) {
    %c0_i32 = arith.constant 0 : i32
    %c0_i32_0 = arith.constant 0 : i32
    %c0_i32_1 = arith.constant 0 : i32
    return %arg0, %c0_i32, %c0_i32_0 : i32, i32, i32
  }
  func.func @transform_1(%arg0: i32) -> (i32, i32) {
    %c0_i32 = arith.constant 0 : i32
    %c0_i32_0 = arith.constant 0 : i32
    %c0_i32_1 = arith.constant 0 : i32
    return %c0_i32, %c0_i32_0 : i32, i32
  }
  func.func @transform_2(%arg0: i32) -> (i32, i32) {
    %c0_i32 = arith.constant 0 : i32
    %c0_i32_0 = arith.constant 0 : i32
    %c0_i32_1 = arith.constant 0 : i32
    return %c0_i32, %c0_i32_0 : i32, i32
  }
  func.func @transform_3(%arg0: i32) -> (i32, i32) {
    %c0_i32 = arith.constant 0 : i32
    %c0_i32_0 = arith.constant 0 : i32
    %c0_i32_1 = arith.constant 0 : i32
    return %c0_i32, %c0_i32_0 : i32, i32
  }
  func.func @transform_4(%arg0: i32) -> (i32, i32) {
    %c0_i32 = arith.constant 0 : i32
    %c0_i32_0 = arith.constant 0 : i32
    %c0_i32_1 = arith.constant 0 : i32
    return %c0_i32, %c0_i32_0 : i32, i32
  }
  func.func @transform_5(%arg0: i32) -> (i32, i32) {
    %c0_i32 = arith.constant 0 : i32
    %c0_i32_0 = arith.constant 0 : i32
    %c0_i32_1 = arith.constant 0 : i32
    return %c0_i32, %c0_i32_0 : i32, i32
  }
  func.func @transform_6(%arg0: i32) -> (i32, i32, i32) {
    %c0_i32 = arith.constant 0 : i32
    %c0_i32_0 = arith.constant 0 : i32
    %c0_i32_1 = arith.constant 0 : i32
    return %arg0, %c0_i32, %c0_i32_0 : i32, i32, i32
  }
}

</mosaic_0001>

<bundles_post_ra>
// kernel: tpu_custom_call.1
= control target key start
LH: loop header
LB: loop body
LE: loop exit
PB: predicated region body
PF: predicated region fallthrough
CT: control target
= control target key end

     0   :  { %11 = vsyncpa [#allocation4], 0  ;;  %s2556_s0 = inlined_call_operand.hbm [shape: f32[2,4,1408], index: 0, kind: input, shape index: {}]   ;;  %s2557_s1 = inlined_call_operand.vmem [shape: f32[8,36], index: 1, kind: input, shape index: {}]   ;;  %s2558_s2 = inlined_call_operand.vmem [shape: f32[8,1], index: 2, kind: input, shape index: {}]   ;;  %s2559_s3 = inlined_call_operand.vmem [shape: f32[8,1], index: 3, kind: input, shape index: {}]   ;;  %s2560_s4 = inlined_call_operand.vmem [shape: f32[8,8], index: 4, kind: input, shape index: {}]   ;;  %s2561_s5 = inlined_call_operand.vmem [shape: f32[1,1280], index: 5, kind: input, shape index: {}]   ;;  %s2562_s6 = inlined_call_operand.hbm [shape: f32[2,8,1280], index: 6, kind: output, shape index: {}]  }
   0x1   :  { %13 = vsyncpa [#allocation4 + $0x1], 0 }
   0x2   :  { %14 = vsyncpa [#allocation5], 0 }
   0x3   :  { %16 = vsyncpa [#allocation5 + $0x1], 0  ;;  %s1981_s21 = smov 0   ;;  %s1983_s22 = smov 0  }
   0x4   :  { %s1985_s23 = smov 0   ;;  %s1987_s24 = smov 0  }
   0x5 LB: > { %s2002_s25 = sadd.s32 4294967295, %s1931_s24   ;;  %s1680_s26 = sadd.s32 4294967294, %s1931_s24   ;;  %s1931_s24 = sphi %s1987_s24, %s2576_s24   ;;  %s1927_s23 = sphi %s1985_s23, %s2575_s23   ;;  %s1923_s22 = sphi %s1983_s22, %s2574_s22   ;;  %s1919_s21 = sphi %s1981_s21, %s2573_s21  }
   0x6   : > { %s2006_s27 = sadd.s32 1, %s1931_s24   ;;  %s29_s28 = sadd.s32 1, %s1927_s23 }
   0x7   : > { %s26_s29 = ssub.s32 %s1931_s24, %s2006_s27  ;;  %p36_p0 = scmp.ne.s32.totalorder %s1927_s23, %s1923_s22 }
   0x8   : > { %p27_p1 = scmp.eq.s32.totalorder %s26_s29, 0  ;;  %p37_p2 = scmp.eq.s32.totalorder %s1931_s24, 0 }
   0x9   : > { %p42_p3 = scmp.ne.s32.totalorder %s1923_s22, %s1919_s21  ;;  %p43_p4 = scmp.eq.s32.totalorder %s2002_s25, 0 }
   0xa   : > { %s2018_s30 = scalar_select %p27_p1, %s1927_s23, %s29_s28  }
   0xb   : > { %p38_p5 = por %p37_p2, %p36_p0  ;;  %p2020_p6 = por %p43_p4, %p42_p3 }
   0xc   : > { %p171_p7 = scmp.eq.s32.totalorder %s2002_s25, 1  ;;  %p177_p8 = scmp.eq.s32.totalorder %s1680_s26, 1 }
   0xd   : > { %p1768_p10 = scmp.lt.s32.totalorder %s1931_s24, 2  ;;  %s212_s10 = sand.u32 1, %s1927_s23  }
   0xe   : > { %p2027_p11 = por %p171_p7, %p36_p0  ;;  %p2031_p12 = por %p177_p8, %p42_p3 }
   0xf   : > { %s1752_s11 = smul.u32 704, %s1931_s24  ;;  %p2042_p13 = pnand %p1768_p10, %p38_p5 }
  0x10   : > { %s2565_s8 = scalar_select %p2027_p11, 1, 0 }
  0x11   : > { %s2566_s9 = scalar_select %p2031_p12, 1, 0 }
  0x12   : > { %s1751_s12 = smul.u32 44, %s212_s10  ;;  %s2040_s15 = scalar_lea.hbm %s2556_s0, %s1752_s11 }
  0x13   : > { %s213_s19 = scalar_lea.sflag [#allocation4], %s212_s10  ;;  %s1835_s20 = scalar_lea.hbm %s2040_s15, 704 }
  0x14   : > { %s216_s17 = scalar_lea.vmem [#allocation3], %s1751_s12  ;;  %p1836_p2 = scmp.ne.s32.totalorder %s2040_s15, %s1835_s20 }
  0x15   : > { %s224_s18 = sshll.u32 %s216_s17, 4  ;;  %p1837_p3 = pneg %p2042_p13  ;;  %s2047_s18 = int_to_ptr.vmem [resolvable:$true] %s224_s18 }
  0x16   : > { %s1840_s29 = scalar_lea.hbm %s2556_s0, 1408  ;;  %p1841_p7 = scmp.lt.u32.totalorder %s2040_s15, %s2556_s0 }
  0x17   : > { %p1838_p4 = pnand %p1837_p3, %p1836_p2  ;;  %p1842_p8 = scmp.lt.u32.totalorder %s1840_s29, %s1835_s20 }
  0x18   : > { %p1844_p9 = scmp.lt.u32.totalorder %s1835_s20, %s2040_s15 }
  0x19   : > { %p1839_p5 = pneg %p1838_p4  ;;  %p1843_p10 = por %p1842_p8, %p1841_p7 }
  0x1b   : > { %p1845_p0 = por %p1844_p9, %p1843_p10 }
  0x1d   : > { %p1846_p1 = pnand %p1845_p0, %p1839_p5 }
  0x1f   : > { %1849 = shalt.err (!%p1846_p1)
}
  0x20   : > { %s1850_s10 = scalar_lea.vmem %s2047_s18, 704  ;;  %s1933_s12 = smov [#allocation3]  }
  0x21   : > { %p1851_p2 = scmp.ne.s32.totalorder %s2047_s18, %s1850_s10  ;;  %s1855_s14 = sshll.u32 %s1933_s12, 4  ;;  %s1856_s14 = int_to_ptr.vmem [resolvable:$false] %s1855_s14 }
  0x22   : > { %s1857_s17 = scalar_lea.vmem %s1856_s14, 1408  ;;  %p1858_p11 = scmp.lt.s32.totalorder %s2047_s18, %s1856_s14 }
  0x23   : > { %p1853_p4 = pnand %p1851_p2, %p1837_p3  ;;  %p1859_p7 = scmp.lt.s32.totalorder %s1857_s17, %s1850_s10 }
  0x25   : > { %p1854_p12 = pneg %p1853_p4  ;;  %p1860_p8 = por %p1859_p7, %p1858_p11 }
  0x27   : > { %p1861_p9 = pnand %p1860_p8, %p1854_p12 }
  0x29   : > { %1864 = shalt.err (!%p1861_p9)
}
  0x2a   : > { %1763 = dma.hbm_to_vmem [thread:$0]  (!%p2042_p13), %s2040_s15, 704, %s2047_s18, %s213_s19  }
  0x2b   : > { %p2568_p0 = scmp.lt.s32.totalorder %s1931_s24, 3  ;;  %p2569_p1 = scmp.ge.s32.totalorder %s1931_s24, 1 }
  0x2d   : > { %p230_p3 = pnand %p2569_p1, %p2568_p0 }
  0x2e   : > { %s2080_s20 = sand.u32 (!%p230_p3), 1, %s1923_s22  }
  0x2f   : > { %233 = sbr.rel (%p230_p3) target bundleno = 1458 (0x5b2), region = 44  ;;  %s236_s28 = scalar_lea.sflag (!%p230_p3), [#allocation4], %s2080_s20 }
  0x30   : > { %s1753_s26 = smul.u32 (!%p230_p3), 44, %s2080_s20 }
  0x32   : > { %s2084_s29 = scalar_lea.vmem (!%p230_p3), [#allocation3], %s1753_s26 }
  0x36   : > { %1910 = dma.done.wait (%p2020_p6), %s236_s28, 704  }
  0x37   : > { %1912 = vsyncadd (%p2020_p6), %s236_s28, 4294966592  ;;  %v2091_v0 = vld [vmem:[%s2084_s29 + $0x8] sm:$0xff]  ;;  %v2094_v1 = vld [vmem:[%s2084_s29] sm:$0xff]  ;;  %s1934_s15 = smov 126   ;;  %s1935_s7 = smov 127   ;;  %v1942_v14 = vmov 0.0  }
  0x38   : > { %v2097_v2 = vld [vmem:[%s2084_s29 + $0x10] sm:$0xff]  ;;  %390 = vrot.lane.b32.xlu1 %v2091_v0, %s1934_s15  ;;  %v2103_v3 = vcombine.high %v2091_v0, %v2091_v0  ;;  %318 = vrot.lane.b32.xlu0 %v2094_v1, %s1935_s7  ;;  %v2109_v4 = vcombine.high %v2094_v1, %v2094_v1  ;;  %v2112_v5 = vld [vmem:[%s2084_s29 + $0x18] sm:$0xff]  ;;  %288 = vst [vmem:[#allocation2] sm:$0xf] %v2094_v1  ;;  %290 = vst [vmem:[#allocation2 + $0x10] sm:$0xf] %v2091_v0 }
  0x39   : > { %v2115_v6 = vld [vmem:[%s2084_s29 + $0x20] sm:$0xff]  ;;  %292 = vst [vmem:[#allocation2 + $0x20] sm:$0xf] %v2097_v2  ;;  %v2122_v7 = vcombine.high %v2097_v2, %v2097_v2  ;;  %294 = vst [vmem:[#allocation2 + $0x30] sm:$0xf] %v2112_v5  ;;  %v2128_v8 = vcombine.high %v2112_v5, %v2112_v5  ;;  %s1936_s16 = smov 94   ;;  %v452_v10 = vcombine.low %v2091_v0, %v2091_v0  ;;  %1012 = vmatprep.mubr.f32.mxu0 %v1942_v14 }
  0x3a   : > { %296 = vst [vmem:[#allocation2 + $0x40] sm:$0xf] %v2115_v6  ;;  %v2132_v9 = vcombine.high %v2115_v6, %v2115_v6  ;;  %289 = vst [vmem:[#allocation2 + $0x8] sm:$0xf] %v2109_v4  ;;  %v310_v11 = vcombine.low %v2094_v1, %v2094_v1  ;;  %s1937_s18 = smov 93   ;;  %s1938_s19 = smov 92   ;;  %v312_v12 = vcombine.low %v2097_v2, %v2097_v2  ;;  %1083 = vmatprep.mubr.f32.mxu1 %v1942_v14 }
  0x3b   : > { %291 = vst [vmem:[#allocation2 + $0x18] sm:$0xf] %v2103_v3  ;;  %293 = vst [vmem:[#allocation2 + $0x28] sm:$0xf] %v2122_v7  ;;  %s1939_s11 = smov 60   ;;  %s1940_s13 = smov 59   ;;  %v313_v13 = vcombine.low %v2112_v5, %v2112_v5  ;;  %v2235_v15 = vcombine.low %v2115_v6, %v2115_v6 }
  0x3c   : > { %388 = vrot.lane.b32.xlu1 %v2109_v4, %s1934_s15  ;;  %459 = vrot.lane.b32.xlu0 %v2094_v1, %s1936_s16  ;;  %295 = vst [vmem:[#allocation2 + $0x38] sm:$0xf] %v2128_v8  ;;  %297 = vst [vmem:[#allocation2 + $0x48] sm:$0xf] %v2132_v9  ;;  %s1941_s10 = smov 58   ;;  %vm408_vm0 = vcmask 1031168  }
  0x3d   : > { %v1825_v18 = vld [vmem:[%s2084_s29 + $0x28] ss:$0 sps:$4 sm:$0xff]   ;;  %vm479_vm1 = vcmask 769024   ;;  %vm338_vm2 = vcmask 1039360   ;;  %vm549_vm3 = vcmask 760832   ;;  %vm620_vm4 = vcmask 752640  }
  0x3e   : > { %v374_v22 = vld [vmem:[%s2084_s29 + $0x28] sm:$0xf]  ;;  %vm690_vm5 = vcmask 490496   ;;  %vm761_vm6 = vcmask 482304   ;;  %vm831_vm7 = vcmask 474112   ;;  %vm917_vm8 = vcmask 1043456  }
  0x3f   : > { %v1826_v27 = vld [vmem:[%s2084_s29 + $0x28] ss:$0 sps:$4 sm:$0xff]   ;;  %vm913_vm9 = vcmask 293888   ;;  %vm1944_vm10 = vmmov 0   ;;  %vm1491_vm11 = vcmask 64512   ;;  %s1596_s28 = scalar_lea.sflag [#allocation5], %s2080_s20 }
  0x40   : > { %461 = vrot.lane.b32.xlu1 %v452_v10, %s1936_s16  ;;  %320 = vrot.lane.b32.xlu0 %v452_v10, %s1935_s7  ;;  %v515_v54 = vld [vmem:[%s2084_s29 + $0x28] sm:$0xf]  ;;  %p2570_p11 = scmp.ne.s32.totalorder %s2565_s8, 0 }
  0x41   : > { %v1827_v59 = vld [vmem:[%s2084_s29 + $0x28] ss:$0 sps:$4 sm:$0xff]  }
  0x44   : > { %386 = vrot.lane.b32.xlu1 %v2094_v1, %s1934_s15  ;;  %316 = vrot.lane.b32.xlu0 %v310_v11, %s1935_s7 }
  0x48   : > { %529 = vrot.lane.b32.xlu1 %v2109_v4, %s1937_s18  ;;  %457 = vrot.lane.b32.xlu0 %v310_v11, %s1936_s16 }
  0x4c   : > { %600 = vrot.lane.b32.xlu1 %v2094_v1, %s1938_s19  ;;  %531 = vrot.lane.b32.xlu0 %v2091_v0, %s1937_s18 }
  0x50   : > { %670 = vrot.lane.b32.xlu1 %v2109_v4, %s1939_s11  ;;  %602 = vrot.lane.b32.xlu0 %v452_v10, %s1938_s19 }
  0x54   : > { %741 = vrot.lane.b32.xlu1 %v2094_v1, %s1940_s13  ;;  %672 = vrot.lane.b32.xlu0 %v2091_v0, %s1939_s11 }
  0x58   : > { %527 = vrot.lane.b32.xlu1 %v2094_v1, %s1937_s18  ;;  %743 = vrot.lane.b32.xlu0 %v452_v10, %s1940_s13 }
  0x5c   : > { %668 = vrot.lane.b32.xlu1 %v2094_v1, %s1939_s11  ;;  %598 = vrot.lane.b32.xlu0 %v310_v11, %s1938_s19 }
  0x60   : > { %322 = vrot.lane.b32.xlu1 %v2091_v0, %s1935_s7  ;;  %739 = vrot.lane.b32.xlu0 %v310_v11, %s1940_s13  ;;  %v1828_v11 = vld [vmem:[%s2084_s29 + $0x28] ss:$0 sps:$4 sm:$0xff]  }
  0x64   : > { %392 = vrot.lane.b32.xlu1 %v2103_v3, %s1934_s15  ;;  %324 = vrot.lane.b32.xlu0 %v312_v12, %s1935_s7 }
  0x68   : > { %463 = vrot.lane.b32.xlu1 %v2091_v0, %s1936_s16  ;;  %394 = vrot.lane.b32.xlu0 %v2097_v2, %s1934_s15 }
  0x6c   : > { %326 = vrot.lane.b32.xlu1 %v2097_v2, %s1935_s7  ;;  %465 = vrot.lane.b32.xlu0 %v312_v12, %s1936_s16 }
  0x70   : > { %396 = vrot.lane.b32.xlu1 %v2122_v7, %s1934_s15  ;;  %328 = vrot.lane.b32.xlu0 %v313_v13, %s1935_s7 }
  0x74   : > { %467 = vrot.lane.b32.xlu1 %v2097_v2, %s1936_s16  ;;  %398 = vrot.lane.b32.xlu0 %v2112_v5, %s1934_s15 }
  0x78   : > { %533 = vrot.lane.b32.xlu1 %v2103_v3, %s1937_s18  ;;  %469 = vrot.lane.b32.xlu0 %v313_v13, %s1936_s16 }
  0x7c   : > { %604 = vrot.lane.b32.xlu1 %v2091_v0, %s1938_s19  ;;  %535 = vrot.lane.b32.xlu0 %v2097_v2, %s1937_s18 }
  0x80   : > { %674 = vrot.lane.b32.xlu1 %v2103_v3, %s1939_s11  ;;  %606 = vrot.lane.b32.xlu0 %v312_v12, %s1938_s19 }
  0x84   : > { %745 = vrot.lane.b32.xlu1 %v2091_v0, %s1940_s13  ;;  %676 = vrot.lane.b32.xlu0 %v2097_v2, %s1939_s11 }
  0x88   : > { %811 = vrot.lane.b32.xlu1 %v2109_v4, %s1941_s10  ;;  %747 = vrot.lane.b32.xlu0 %v312_v12, %s1940_s13 }
  0x8c   : > { %809 = vrot.lane.b32.xlu1 %v2094_v1, %s1941_s10  ;;  %813 = vrot.lane.b32.xlu0 %v2091_v0, %s1941_s10 }
  0x90   : > { %539 = vrot.lane.b32.xlu1 %v2112_v5, %s1937_s18  ;;  %537 = vrot.lane.b32.xlu0 %v2122_v7, %s1937_s18 }
  0x94   : > { %610 = vrot.lane.b32.xlu1 %v313_v13, %s1938_s19  ;;  %608 = vrot.lane.b32.xlu0 %v2097_v2, %s1938_s19 }
  0x98   : > { %680 = vrot.lane.b32.xlu1 %v2112_v5, %s1939_s11  ;;  %678 = vrot.lane.b32.xlu0 %v2122_v7, %s1939_s11 }
  0x9c   : > { %751 = vrot.lane.b32.xlu1 %v313_v13, %s1940_s13  ;;  %749 = vrot.lane.b32.xlu0 %v2097_v2, %s1940_s13 }
  0xa0   : > { %332 = vrot.lane.b32.xlu1 %v2235_v15, %s1935_s7  ;;  %330 = vrot.lane.b32.xlu0 %v2112_v5, %s1935_s7 }
  0xa4   : > { %402 = vrot.lane.b32.xlu1 %v2115_v6, %s1934_s15  ;;  %400 = vrot.lane.b32.xlu0 %v2128_v8, %s1934_s15 }
  0xa8   : > { %473 = vrot.lane.b32.xlu1 %v2235_v15, %s1936_s16  ;;  %471 = vrot.lane.b32.xlu0 %v2112_v5, %s1936_s16 }
  0xaa   : > { %v2249_v16 = vpop.permute.xlu1 %390  ;;  %v319_v17 = vpop.permute.xlu0 %318 }
  0xac   : > { %817 = vrot.lane.b32.xlu1 %v2097_v2, %s1941_s10  ;;  %815 = vrot.lane.b32.xlu0 %v2103_v3, %s1941_s10  ;;  %v656_v3 = vld [vmem:[%s2084_s29 + $0x28] sm:$0xf] }
  0xae   : > { %v389_v19 = vpop.permute.xlu1 %388  ;;  %v460_v20 = vpop.permute.xlu0 %459 }
  0xaf   : > { %v410_v21 = vsel %vm408_vm0, %v389_v19, %v2249_v16 }
  0xb0   : > { %430 = vst [vmem:[#allocation2 + $0x58] sm:$0xf] %v410_v21  ;;  %336 = vrot.lane.b32.xlu1 %v1825_v18, %s1935_s7  ;;  %334 = vrot.lane.b32.xlu0 %v2115_v6, %s1935_s7 }
  0xb2   : > { %v2262_v23 = vpop.permute.xlu1 %461  ;;  %v2264_v24 = vpop.permute.xlu0 %320 }
  0xb3   : > { %v481_v25 = vsel %vm479_vm1, %v460_v20, %v2262_v23  ;;  %v340_v26 = vsel %vm338_vm2, %v319_v17, %v2264_v24 }
  0xb4   : > { %501 = vst [vmem:[#allocation2 + $0x58] sm:$0xf0] %v481_v25  ;;  %360 = vst [vmem:[#allocation2 + $0x8] sm:$0xf0] %v340_v26  ;;  %406 = vrot.lane.b32.xlu1 %v374_v22, %s1934_s15  ;;  %404 = vrot.lane.b32.xlu0 %v2132_v9, %s1934_s15  ;;  %s1945_s15 = smov [#allocation6]  }
  0xb5   : > { %s1869_s7 = sshll.u32 %s1945_s15, 4  ;;  %s1870_s7 = int_to_ptr.vmem [resolvable:$false] %s1869_s7 }
  0xb6   : > { %v387_v28 = vpop.permute.xlu1 %386  ;;  %v317_v29 = vpop.permute.xlu0 %316 }
  0xb7   : > { %v409_v30 = vsel %vm408_vm0, %v387_v28, %v389_v19  ;;  %v339_v31 = vsel %vm338_vm2, %v317_v29, %v319_v17 }
  0xb8   : > { %429 = vst [vmem:[#allocation2 + $0x50] sm:$0xf] %v409_v30  ;;  %359 = vst [vmem:[#allocation2] sm:$0xf0] %v339_v31  ;;  %477 = vrot.lane.b32.xlu1 %v1826_v27, %s1936_s16  ;;  %475 = vrot.lane.b32.xlu0 %v2115_v6, %s1936_s16  ;;  %s1871_s16 = scalar_lea.vmem %s1870_s7, 2560 }
  0xba   : > { %v530_v32 = vpop.permute.xlu1 %529  ;;  %v458_v33 = vpop.permute.xlu0 %457 }
  0xbb   : > { %v480_v34 = vsel %vm479_vm1, %v458_v33, %v460_v20  ;;  %v864_v35 = vld [vmem:[#allocation2 + $0x8] sm:$0xff]  ;;  %v874_v36 = vld [vmem:[#allocation2 + $0x58] sm:$0xff] }
  0xbc   : > { %500 = vst [vmem:[#allocation2 + $0x50] sm:$0xf0] %v480_v34  ;;  %543 = vrot.lane.b32.xlu1 %v2115_v6, %s1937_s18  ;;  %541 = vrot.lane.b32.xlu0 %v2128_v8, %s1937_s18  ;;  %v1711_v37 = vpack.c.bf16 %v874_v36, %v864_v35 }
  0xbe   : > { %v601_v38 = vpop.permute.xlu1 %600  ;;  %v2284_v39 = vpop.permute.xlu0 %531  ;;  %1712 = vmatprep.subr.bf16.mxu0 %v1711_v37 }
  0xbf   : > { %v551_v40 = vsel %vm549_vm3, %v530_v32, %v2284_v39  ;;  %v863_v44 = vld [vmem:[#allocation2] sm:$0xff] }
  0xc0   : > { %571 = vst [vmem:[#allocation2 + $0xa8] sm:$0xf] %v551_v40  ;;  %614 = vrot.lane.b32.xlu1 %v2235_v15, %s1938_s19  ;;  %612 = vrot.lane.b32.xlu0 %v2112_v5, %s1938_s19 }
  0xc2   : > { %v671_v41 = vpop.permute.xlu1 %670  ;;  %v2292_v42 = vpop.permute.xlu0 %602 }
  0xc3   : > { %v622_v43 = vsel %vm620_vm4, %v601_v38, %v2292_v42  ;;  %v873_v45 = vld [vmem:[#allocation2 + $0x50] sm:$0xff] }
  0xc4   : > { %642 = vst [vmem:[#allocation2 + $0xa8] sm:$0xf0] %v622_v43  ;;  %684 = vrot.lane.b32.xlu1 %v2115_v6, %s1939_s11  ;;  %682 = vrot.lane.b32.xlu0 %v2128_v8, %s1939_s11  ;;  %v1713_v46 = vpack.c.bf16 %v873_v45, %v863_v44 }
  0xc6   : > { %v742_v47 = vpop.permute.xlu1 %741  ;;  %v2300_v48 = vpop.permute.xlu0 %672  ;;  %1714 = vmatpush1.bf16.msra.mxu0 %v1713_v46 }
  0xc7   : > { %v692_v49 = vsel %vm690_vm5, %v671_v41, %v2300_v48 }
  0xc8   : > { %712 = vst [vmem:[#allocation2 + $0xf8] sm:$0xf] %v692_v49  ;;  %755 = vrot.lane.b32.xlu1 %v2235_v15, %s1940_s13  ;;  %753 = vrot.lane.b32.xlu0 %v2112_v5, %s1940_s13 }
  0xca   : > { %v528_v50 = vpop.permute.xlu1 %527  ;;  %v2308_v51 = vpop.permute.xlu0 %743 }
  0xcb   : > { %v550_v52 = vsel %vm549_vm3, %v528_v50, %v530_v32  ;;  %v763_v53 = vsel %vm761_vm6, %v742_v47, %v2308_v51  ;;  %v884_v0 = vld [vmem:[#allocation2 + $0xa8] sm:$0xff] }
  0xcc   : > { %570 = vst [vmem:[#allocation2 + $0xa0] sm:$0xf] %v550_v52  ;;  %783 = vst [vmem:[#allocation2 + $0xf8] sm:$0xf0] %v763_v53  ;;  %821 = vrot.lane.b32.xlu1 %v2112_v5, %s1941_s10  ;;  %819 = vrot.lane.b32.xlu0 %v2122_v7, %s1941_s10 }
  0xce   : > { %v669_v55 = vpop.permute.xlu1 %668  ;;  %v599_v56 = vpop.permute.xlu0 %598 }
  0xcf   : > { %v691_v57 = vsel %vm690_vm5, %v669_v55, %v671_v41  ;;  %v621_v58 = vsel %vm620_vm4, %v599_v56, %v601_v38 }
  0xd0   : > { %711 = vst [vmem:[#allocation2 + $0xf0] sm:$0xf] %v691_v57  ;;  %641 = vst [vmem:[#allocation2 + $0xa0] sm:$0xf0] %v621_v58  ;;  %547 = vrot.lane.b32.xlu1 %v515_v54, %s1937_s18  ;;  %545 = vrot.lane.b32.xlu0 %v2132_v9, %s1937_s18 }
  0xd2   : > { %v323_v60 = vpop.permute.xlu1 %322  ;;  %v740_v61 = vpop.permute.xlu0 %739 }
  0xd3   : > { %v341_v62 = vsel %vm338_vm2, %v2264_v24, %v323_v60  ;;  %v762_v63 = vsel %vm761_vm6, %v740_v61, %v742_v47  ;;  %v894_v1 = vld [vmem:[#allocation2 + $0xf8] sm:$0xff] }
  0xd4   : > { %361 = vst [vmem:[#allocation2 + $0x10] sm:$0xf0] %v341_v62  ;;  %782 = vst [vmem:[#allocation2 + $0xf0] sm:$0xf0] %v762_v63  ;;  %618 = vrot.lane.b32.xlu1 %v1827_v59, %s1938_s19  ;;  %616 = vrot.lane.b32.xlu0 %v2115_v6, %s1938_s19  ;;  %v1715_v2 = vpack.c.bf16 %v894_v1, %v884_v0  ;;  %v797_v24 = vld [vmem:[%s2084_s29 + $0x28] sm:$0xf] }
  0xd6   : > { %v393_v4 = vpop.permute.xlu1 %392  ;;  %v325_v5 = vpop.permute.xlu0 %324  ;;  %1716 = vmatprep.subr.bf16.mxu0 %v1715_v2 }
  0xd7   : > { %v411_v7 = vsel %vm408_vm0, %v2249_v16, %v393_v4  ;;  %v342_v10 = vsel %vm338_vm2, %v323_v60, %v325_v5  ;;  %v883_v18 = vld [vmem:[#allocation2 + $0xa0] sm:$0xff] }
  0xd8   : > { %431 = vst [vmem:[#allocation2 + $0x60] sm:$0xf] %v411_v7  ;;  %362 = vst [vmem:[#allocation2 + $0x18] sm:$0xf0] %v342_v10  ;;  %688 = vrot.lane.b32.xlu1 %v656_v3, %s1939_s11  ;;  %686 = vrot.lane.b32.xlu0 %v2132_v9, %s1939_s11 }
  0xda   : > { %v464_v12 = vpop.permute.xlu1 %463  ;;  %v395_v13 = vpop.permute.xlu0 %394 }
  0xdb   : > { %v482_v15 = vsel %vm479_vm1, %v2262_v23, %v464_v12  ;;  %v412_v17 = vsel %vm408_vm0, %v393_v4, %v395_v13  ;;  %v893_v16 = vld [vmem:[#allocation2 + $0xf0] sm:$0xff] }
  0xdc   : > { %502 = vst [vmem:[#allocation2 + $0x60] sm:$0xf0] %v482_v15  ;;  %432 = vst [vmem:[#allocation2 + $0x68] sm:$0xf] %v412_v17  ;;  %759 = vrot.lane.b32.xlu1 %v1828_v11, %s1940_s13  ;;  %757 = vrot.lane.b32.xlu0 %v2115_v6, %s1940_s13  ;;  %v1717_v19 = vpack.c.bf16 %v893_v16, %v883_v18  ;;  %v865_v35 = vld [vmem:[#allocation2 + $0x10] sm:$0xff]  ;;  %v2395_v11 = vld [vmem:[%s2557_s1] sm:$0xff] }
  0xdd   : > { %s1754_s13 = smul.u32 80, %s2080_s20 }
  0xde   : > { %v327_v20 = vpop.permute.xlu1 %326  ;;  %v466_v21 = vpop.permute.xlu0 %465  ;;  %1718 = vmatpush1.bf16.msra.mxu0 %v1717_v19 }
  0xdf   : > { %v343_v22 = vsel %vm338_vm2, %v325_v5, %v327_v20  ;;  %v483_v23 = vsel %vm479_vm1, %v464_v12, %v466_v21  ;;  %v866_v32 = vld [vmem:[#allocation2 + $0x18] sm:$0xff]  ;;  %s267_s12 = scalar_lea.vmem [#allocation6], %s1754_s13 }
  0xe0   : > { %363 = vst [vmem:[#allocation2 + $0x20] sm:$0xf0] %v343_v22  ;;  %503 = vst [vmem:[#allocation2 + $0x68] sm:$0xf0] %v483_v23  ;;  %825 = vrot.lane.b32.xlu1 %v2115_v6, %s1941_s10  ;;  %823 = vrot.lane.b32.xlu0 %v2128_v8, %s1941_s10  ;;  %s1610_s14 = sshll.u32 %s267_s12, 4  ;;  %s2514_s14 = int_to_ptr.vmem [resolvable:$true] %s1610_s14 }
  0xe1   : > { %s1865_s29 = scalar_lea.vmem %s2514_s14, 1280  ;;  %p1872_p5 = scmp.lt.s32.totalorder %s2514_s14, %s1870_s7 }
  0xe2   : > { %v397_v25 = vpop.permute.xlu1 %396  ;;  %v2351_v26 = vpop.permute.xlu0 %328  ;;  %p1866_p6 = scmp.ne.s32.totalorder %s2514_s14, %s1865_s29  ;;  %p1873_p10 = scmp.lt.s32.totalorder %s1871_s16, %s1865_s29 }
  0xe3   : > { %v413_v27 = vsel %vm408_vm0, %v395_v13, %v397_v25  ;;  %v344_v28 = vsel %vm338_vm2, %v327_v20, %v2351_v26  ;;  %v875_v8 = vld [vmem:[#allocation2 + $0x60] sm:$0xff] }
  0xe4   : > { %433 = vst [vmem:[#allocation2 + $0x70] sm:$0xf] %v413_v27  ;;  %364 = vst [vmem:[#allocation2 + $0x28] sm:$0xf0] %v344_v28  ;;  %829 = vrot.lane.b32.xlu1 %v797_v24, %s1941_s10  ;;  %827 = vrot.lane.b32.xlu0 %v2132_v9, %s1941_s10  ;;  %v1721_v36 = vpack.c.bf16 %v875_v8, %v865_v35  ;;  %s1755_s10 = smul.u32 1280, %s2002_s25  ;;  %p1867_p12 = pnand %p1866_p6, %p2570_p11 }
  0xe5   : > { %p1874_p2 = por %p1873_p10, %p1872_p5 }
  0xe6   : > { %v468_v6 = vpop.permute.xlu1 %467  ;;  %v2359_v29 = vpop.permute.xlu0 %398  ;;  %s2512_s26 = scalar_lea.hbm %s2562_s6, %s1755_s10  ;;  %p1868_p13 = pneg %p1867_p12 }
  0xe7   : > { %v484_v30 = vsel %vm479_vm1, %v466_v21, %v468_v6  ;;  %v414_v31 = vsel %vm408_vm0, %v397_v25, %v2359_v29  ;;  %v876_v33 = vld [vmem:[#allocation2 + $0x68] sm:$0xff]  ;;  %v867_v20 = vld [vmem:[#allocation2 + $0x20] sm:$0xff] }
  0xe8   : > { %504 = vst [vmem:[#allocation2 + $0x70] sm:$0xf0] %v484_v30  ;;  %434 = vst [vmem:[#allocation2 + $0x78] sm:$0xf] %v414_v31  ;;  %v1719_v34 = vpack.c.bf16 %v876_v33, %v866_v32  ;;  %p1875_p4 = pnand %p1874_p2, %p1868_p13 }
  0xea   : > { %v534_v37 = vpop.permute.xlu1 %533  ;;  %v2364_v38 = vpop.permute.xlu0 %469  ;;  %1720 = vmatprep.subr.bf16.mxu1 %v1719_v34 }
  0xeb   : > { %v552_v9 = vsel %vm549_vm3, %v2284_v39, %v534_v37  ;;  %v485_v40 = vsel %vm479_vm1, %v468_v6, %v2364_v38  ;;  %1722 = vmatpush1.bf16.msra.mxu1 %v1721_v36  ;;  %v868_v16 = vld [vmem:[#allocation2 + $0x28] sm:$0xff] }
  0xec   : > { %572 = vst [vmem:[#allocation2 + $0xb0] sm:$0xf] %v552_v9  ;;  %505 = vst [vmem:[#allocation2 + $0x78] sm:$0xf0] %v485_v40 }
  0xee   : > { %v605_v41 = vpop.permute.xlu1 %604  ;;  %v536_v43 = vpop.permute.xlu0 %535 }
  0xef   : > { %v623_v44 = vsel %vm620_vm4, %v2292_v42, %v605_v41  ;;  %v553_v45 = vsel %vm549_vm3, %v534_v37, %v536_v43  ;;  %v877_v12 = vld [vmem:[#allocation2 + $0x70] sm:$0xff] }
  0xf0   : > { %643 = vst [vmem:[#allocation2 + $0xb0] sm:$0xf0] %v623_v44  ;;  %573 = vst [vmem:[#allocation2 + $0xb8] sm:$0xf] %v553_v45  ;;  %v1729_v21 = vpack.c.bf16 %v877_v12, %v867_v20 }
  0xf2   : > { %v675_v46 = vpop.permute.xlu1 %674  ;;  %v607_v47 = vpop.permute.xlu0 %606 }
  0xf3   : > { %v693_v39 = vsel %vm690_vm5, %v2300_v48, %v675_v46  ;;  %v624_v49 = vsel %vm620_vm4, %v605_v41, %v607_v47  ;;  %v878_v5 = vld [vmem:[#allocation2 + $0x78] sm:$0xff] }
  0xf4   : > { %713 = vst [vmem:[#allocation2 + $0x100] sm:$0xf] %v693_v39  ;;  %644 = vst [vmem:[#allocation2 + $0xb8] sm:$0xf0] %v624_v49  ;;  %v1727_v19 = vpack.c.bf16 %v878_v5, %v868_v16 }
  0xf6   : > { %v746_v50 = vpop.permute.xlu1 %745  ;;  %v677_v52 = vpop.permute.xlu0 %676 }
  0xf7   : > { %v764_v53 = vsel %vm761_vm6, %v2308_v51, %v746_v50  ;;  %v694_v42 = vsel %vm690_vm5, %v675_v46, %v677_v52  ;;  %v885_v3 = vld [vmem:[#allocation2 + $0xb0] sm:$0xff] }
  0xf8   : > { %784 = vst [vmem:[#allocation2 + $0x100] sm:$0xf0] %v764_v53  ;;  %714 = vst [vmem:[#allocation2 + $0x108] sm:$0xf] %v694_v42 }
  0xfa   : > { %v812_v54 = vpop.permute.xlu1 %811  ;;  %v748_v55 = vpop.permute.xlu0 %747 }
  0xfb   : > { %v765_v56 = vsel %vm761_vm6, %v746_v50, %v748_v55  ;;  %v886_v0 = vld [vmem:[#allocation2 + $0xb8] sm:$0xff] }
  0xfc   : > { %785 = vst [vmem:[#allocation2 + $0x108] sm:$0xf0] %v765_v56 }
  0xfe   : > { %v810_v48 = vpop.permute.xlu1 %809  ;;  %v2380_v57 = vpop.permute.xlu0 %813 }
  0xff   : > { %v832_v58 = vsel %vm831_vm7, %v810_v48, %v812_v54  ;;  %v833_v59 = vsel %vm831_vm7, %v812_v54, %v2380_v57  ;;  %v895_v61 = vld [vmem:[#allocation2 + $0x100] sm:$0xff] }
 0x100   : > { %852 = vst [vmem:[#allocation2 + $0x140] sm:$0xf] %v832_v58  ;;  %853 = vst [vmem:[#allocation2 + $0x148] sm:$0xf] %v833_v59  ;;  %v1725_v4 = vpack.c.bf16 %v895_v61, %v885_v3 }
 0x102   : > { %v2385_v51 = vpop.permute.xlu1 %539  ;;  %v538_v60 = vpop.permute.xlu0 %537 }
 0x103   : > { %v554_v62 = vsel %vm549_vm3, %v536_v43, %v538_v60  ;;  %v555_v63 = vsel %vm549_vm3, %v538_v60, %v2385_v51  ;;  %v896_v1 = vld [vmem:[#allocation2 + $0x108] sm:$0xff] }
 0x104   : > { %574 = vst [vmem:[#allocation2 + $0xc0] sm:$0xf] %v554_v62  ;;  %575 = vst [vmem:[#allocation2 + $0xc8] sm:$0xf] %v555_v63  ;;  %v1723_v2 = vpack.c.bf16 %v896_v1, %v886_v0 }
 0x106   : > { %v2390_v7 = vpop.permute.xlu1 %610  ;;  %v609_v10 = vpop.permute.xlu0 %608  ;;  %1724 = vmatprep.subr.bf16.mxu1 %v1723_v2 }
 0x107   : > { %v625_v13 = vsel %vm620_vm4, %v607_v47, %v609_v10  ;;  %v626_v15 = vsel %vm620_vm4, %v609_v10, %v2390_v7  ;;  %1726 = vmatpush1.bf16.msra.mxu1 %v1725_v4  ;;  %v904_v17 = vld [vmem:[#allocation2 + $0x148] sm:$0xf]  ;;  %v903_v18 = vld [vmem:[#allocation2 + $0x140] sm:$0xf] }
 0x108   : > { %645 = vst [vmem:[#allocation2 + $0xc0] sm:$0xf0] %v625_v13  ;;  %646 = vst [vmem:[#allocation2 + $0xc8] sm:$0xf0] %v626_v15  ;;  %1685 = vmatprep.subr.msk.mxu0 %vm917_vm8, %v904_v17 }
 0x109   : > { %1686 = vmatpush1.msk.msra.mxu0 %vm917_vm8, %v903_v18 }
 0x10a   : > { %v2402_v22 = vpop.permute.xlu1 %680  ;;  %v679_v23 = vpop.permute.xlu0 %678  ;;  %1728 = vmatprep.subr.bf16.mxu0 %v1727_v19  ;;  %1687 = vmatmul.mubr.msk.f32.vlgmr.msra.gmra.mrb[0].mxu0 %vm913_vm9, %v2395_v11 }
 0x10b   : > { %v695_v24 = vsel %vm690_vm5, %v677_v52, %v679_v23  ;;  %v696_v25 = vsel %vm690_vm5, %v679_v23, %v2402_v22  ;;  %1730 = vmatpush1.bf16.msra.mxu0 %v1729_v21  ;;  %1154 = vmatprep.mubr.f32.mxu0 %v1942_v14 }
 0x10c   : > { %715 = vst [vmem:[#allocation2 + $0x110] sm:$0xf] %v695_v24  ;;  %716 = vst [vmem:[#allocation2 + $0x118] sm:$0xf] %v696_v25 }
 0x10e   : > { %v2410_v27 = vpop.permute.xlu1 %751  ;;  %v750_v28 = vpop.permute.xlu0 %749 }
 0x10f   : > { %v766_v6 = vsel %vm761_vm6, %v748_v55, %v750_v28  ;;  %v767_v8 = vsel %vm761_vm6, %v750_v28, %v2410_v27  ;;  %v888_v36 = vld [vmem:[#allocation2 + $0xc8] sm:$0xff]  ;;  %v887_v41 = vld [vmem:[#allocation2 + $0xc0] sm:$0xff] }
 0x110   : > { %786 = vst [vmem:[#allocation2 + $0x110] sm:$0xf0] %v766_v6  ;;  %787 = vst [vmem:[#allocation2 + $0x118] sm:$0xf0] %v767_v8 }
 0x112   : > { %v333_v30 = vpop.permute.xlu1 %332  ;;  %v331_v31 = vpop.permute.xlu0 %330 }
 0x113   : > { %v345_v32 = vsel %vm338_vm2, %v2351_v26, %v331_v31  ;;  %v346_v33 = vsel %vm338_vm2, %v331_v31, %v333_v30 }
 0x114   : > { %365 = vst [vmem:[#allocation2 + $0x30] sm:$0xf0] %v345_v32  ;;  %366 = vst [vmem:[#allocation2 + $0x38] sm:$0xf0] %v346_v33 }
 0x116   : > { %v403_v34 = vpop.permute.xlu1 %402  ;;  %v401_v35 = vpop.permute.xlu0 %400 }
 0x117   : > { %v415_v37 = vsel %vm408_vm0, %v2359_v29, %v401_v35  ;;  %v416_v9 = vsel %vm408_vm0, %v401_v35, %v403_v34  ;;  %v898_v40 = vld [vmem:[#allocation2 + $0x118] sm:$0xff]  ;;  %v897_v43 = vld [vmem:[#allocation2 + $0x110] sm:$0xff] }
 0x118   : > { %435 = vst [vmem:[#allocation2 + $0x80] sm:$0xf] %v415_v37  ;;  %436 = vst [vmem:[#allocation2 + $0x88] sm:$0xf] %v416_v9  ;;  %v1731_v44 = vpack.c.bf16 %v898_v40, %v888_v36  ;;  %v1733_v45 = vpack.c.bf16 %v897_v43, %v887_v41 }
 0x11a   : > { %v474_v26 = vpop.permute.xlu1 %473  ;;  %v472_v46 = vpop.permute.xlu0 %471  ;;  %1732 = vmatprep.subr.bf16.mxu0 %v1731_v44 }
 0x11b   : > { %v486_v47 = vsel %vm479_vm1, %v2364_v38, %v472_v46  ;;  %v487_v39 = vsel %vm479_vm1, %v472_v46, %v474_v26  ;;  %1734 = vmatpush1.bf16.msra.mxu0 %v1733_v45  ;;  %v870_v62 = vld [vmem:[#allocation2 + $0x38] sm:$0xff]  ;;  %v869_v0 = vld [vmem:[#allocation2 + $0x30] sm:$0xff] }
 0x11c   : > { %506 = vst [vmem:[#allocation2 + $0x80] sm:$0xf0] %v486_v47  ;;  %507 = vst [vmem:[#allocation2 + $0x88] sm:$0xf0] %v487_v39 }
 0x11e   : > { %v2424_v29 = vpop.permute.xlu1 %817  ;;  %v816_v49 = vpop.permute.xlu0 %815 }
 0x11f   : > { %v834_v50 = vsel %vm831_vm7, %v2380_v57, %v816_v49  ;;  %v835_v52 = vsel %vm831_vm7, %v816_v49, %v2424_v29 }
 0x120   : > { %854 = vst [vmem:[#allocation2 + $0x150] sm:$0xf] %v834_v50  ;;  %855 = vst [vmem:[#allocation2 + $0x158] sm:$0xf] %v835_v52 }
 0x122   : > { %v337_v53 = vpop.permute.xlu1 %336  ;;  %v335_v42 = vpop.permute.xlu0 %334 }
 0x123   : > { %v347_v38 = vsel %vm338_vm2, %v333_v30, %v335_v42  ;;  %v348_v54 = vsel %vm338_vm2, %v335_v42, %v337_v53  ;;  %v880_v55 = vld [vmem:[#allocation2 + $0x88] sm:$0xff]  ;;  %v879_v58 = vld [vmem:[#allocation2 + $0x80] sm:$0xff] }
 0x124   : > { %367 = vst [vmem:[#allocation2 + $0x40] sm:$0xf0] %v347_v38  ;;  %368 = vst [vmem:[#allocation2 + $0x48] sm:$0xf0] %v348_v54  ;;  %v1735_v63 = vpack.c.bf16 %v880_v55, %v870_v62  ;;  %v1737_v1 = vpack.c.bf16 %v879_v58, %v869_v0 }
 0x126   : > { %v407_v56 = vpop.permute.xlu1 %406  ;;  %v405_v48 = vpop.permute.xlu0 %404 }
 0x127   : > { %v417_v59 = vsel %vm408_vm0, %v403_v34, %v405_v48  ;;  %v418_v57 = vsel %vm408_vm0, %v405_v48, %v407_v56  ;;  %v906_v60 = vld [vmem:[#allocation2 + $0x158] sm:$0xf]  ;;  %v905_v61 = vld [vmem:[#allocation2 + $0x150] sm:$0xf] }
 0x128   : > { %437 = vst [vmem:[#allocation2 + $0x90] sm:$0xf] %v417_v59  ;;  %438 = vst [vmem:[#allocation2 + $0x98] sm:$0xf] %v418_v57  ;;  %1688 = vmatprep.subr.msk.mxu1 %vm917_vm8, %v906_v60 }
 0x129   : > { %1689 = vmatpush1.msk.msra.mxu1 %vm917_vm8, %v905_v61 }
 0x12a   : > { %v478_v2 = vpop.permute.xlu1 %477  ;;  %v476_v3 = vpop.permute.xlu0 %475  ;;  %1736 = vmatprep.subr.bf16.mxu1 %v1735_v63  ;;  %1690 = vmatmul.mubr.msk.f32.vlgmr.msra.gmra.mrb[0].mxu1 %vm913_vm9, %v2395_v11 }
 0x12b   : > { %v488_v4 = vsel %vm479_vm1, %v474_v26, %v476_v3  ;;  %v489_v5 = vsel %vm479_vm1, %v476_v3, %v478_v2  ;;  %1738 = vmatpush1.bf16.msra.mxu1 %v1737_v1  ;;  %1225 = vmatprep.mubr.f32.mxu1 %v1942_v14  ;;  %v871_v50 = vld [vmem:[#allocation2 + $0x40] sm:$0xff] }
 0x12c   : > { %508 = vst [vmem:[#allocation2 + $0x90] sm:$0xf0] %v488_v4  ;;  %509 = vst [vmem:[#allocation2 + $0x98] sm:$0xf0] %v489_v5 }
 0x12e   : > { %v544_v10 = vpop.permute.xlu1 %543  ;;  %v542_v12 = vpop.permute.xlu0 %541 }
 0x12f   : > { %v556_v13 = vsel %vm549_vm3, %v2385_v51, %v542_v12  ;;  %v557_v15 = vsel %vm549_vm3, %v542_v12, %v544_v10 }
 0x130   : > { %576 = vst [vmem:[#allocation2 + $0xd0] sm:$0xf] %v556_v13  ;;  %577 = vst [vmem:[#allocation2 + $0xd8] sm:$0xf] %v557_v15 }
 0x132   : > { %v615_v17 = vpop.permute.xlu1 %614  ;;  %v613_v18 = vpop.permute.xlu0 %612 }
 0x133   : > { %v627_v16 = vsel %vm620_vm4, %v2390_v7, %v613_v18  ;;  %v628_v19 = vsel %vm620_vm4, %v613_v18, %v615_v17  ;;  %v882_v41 = vld [vmem:[#allocation2 + $0x98] sm:$0xff]  ;;  %v881_v45 = vld [vmem:[#allocation2 + $0x90] sm:$0xff] }
 0x134   : > { %647 = vst [vmem:[#allocation2 + $0xd0] sm:$0xf0] %v627_v16  ;;  %648 = vst [vmem:[#allocation2 + $0xd8] sm:$0xf0] %v628_v19  ;;  %v1745_v52 = vpack.c.bf16 %v881_v45, %v871_v50  ;;  %v1307_v16 = vlaneseq }
 0x136   : > { %v685_v20 = vpop.permute.xlu1 %684  ;;  %v683_v21 = vpop.permute.xlu0 %682  ;;  %v1308_v19 = vshrl.u32 %v1307_v16, 7 }
 0x137   : > { %v697_v23 = vsel %vm690_vm5, %v2402_v22, %v683_v21  ;;  %v698_v51 = vsel %vm690_vm5, %v683_v21, %v685_v20  ;;  %v1303_v21 = vld [vmem:[%s2561_s5] sm:$0xff] }
 0x138   : > { %717 = vst [vmem:[#allocation2 + $0x120] sm:$0xf] %v697_v23  ;;  %718 = vst [vmem:[#allocation2 + $0x128] sm:$0xf] %v698_v51  ;;  %v1313_v23 = vsub.s32 1, %v1308_v19 }
 0x13a   : > { %v756_v24 = vpop.permute.xlu1 %755  ;;  %v754_v25 = vpop.permute.xlu0 %753 }
 0x13b   : > { %v768_v28 = vsel %vm761_vm6, %v2410_v27, %v754_v25  ;;  %v769_v7 = vsel %vm761_vm6, %v754_v25, %v756_v24  ;;  %v890_v33 = vld [vmem:[#allocation2 + $0xd8] sm:$0xff]  ;;  %v889_v36 = vld [vmem:[#allocation2 + $0xd0] sm:$0xff] }
 0x13c   : > { %788 = vst [vmem:[#allocation2 + $0x120] sm:$0xf0] %v768_v28  ;;  %789 = vst [vmem:[#allocation2 + $0x128] sm:$0xf0] %v769_v7 }
 0x13e   : > { %v822_v6 = vpop.permute.xlu1 %821  ;;  %v820_v8 = vpop.permute.xlu0 %819 }
 0x13f   : > { %v836_v30 = vsel %vm831_vm7, %v2424_v29, %v820_v8  ;;  %v837_v22 = vsel %vm831_vm7, %v820_v8, %v822_v6  ;;  %v872_v29 = vld [vmem:[#allocation2 + $0x48] sm:$0xff] }
 0x140   : > { %856 = vst [vmem:[#allocation2 + $0x160] sm:$0xf] %v836_v30  ;;  %857 = vst [vmem:[#allocation2 + $0x168] sm:$0xf] %v837_v22  ;;  %v1743_v49 = vpack.c.bf16 %v882_v41, %v872_v29  ;;  %v1317_v30 = vsub.s32 2, %v1308_v19  ;;  %v1321_v22 = vsub.s32 3, %v1308_v19 }
 0x141   : > { %v1337_v29 = vsub.s32 7, %v1308_v19 }
 0x142   : > { %v548_v31 = vpop.permute.xlu1 %547  ;;  %v546_v32 = vpop.permute.xlu0 %545 }
 0x143   : > { %v558_v34 = vsel %vm549_vm3, %v544_v10, %v546_v32  ;;  %v559_v27 = vsel %vm549_vm3, %v546_v32, %v548_v31  ;;  %v900_v35 = vld [vmem:[#allocation2 + $0x128] sm:$0xff]  ;;  %v899_v37 = vld [vmem:[#allocation2 + $0x120] sm:$0xff]  ;;  %v1318_v31 = vrot.slane %v1303_v21, %v1317_v30  ;;  %v1322_v32 = vrot.slane %v1303_v21, %v1321_v22 }
 0x144   : > { %578 = vst [vmem:[#allocation2 + $0xe0] sm:$0xf] %v558_v34  ;;  %579 = vst [vmem:[#allocation2 + $0xe8] sm:$0xf] %v559_v27  ;;  %v1739_v9 = vpack.c.bf16 %v900_v35, %v890_v33  ;;  %v1741_v40 = vpack.c.bf16 %v899_v37, %v889_v36  ;;  %v1325_v37 = vsub.s32 4, %v1308_v19  ;;  %v1338_v50 = vrot.slane %v1303_v21, %v1337_v29 }
 0x146   : > { %v619_v43 = vpop.permute.xlu1 %618  ;;  %v617_v44 = vpop.permute.xlu0 %616  ;;  %1740 = vmatprep.subr.bf16.mxu1 %v1739_v9  ;;  %v1329_v9 = vsub.s32 5, %v1308_v19 }
 0x147   : > { %v629_v26 = vsel %vm620_vm4, %v615_v17, %v617_v44  ;;  %v630_v46 = vsel %vm620_vm4, %v617_v44, %v619_v43  ;;  %1742 = vmatpush1.bf16.msra.mxu1 %v1741_v40  ;;  %v908_v47 = vld [vmem:[#allocation2 + $0x168] sm:$0xf]  ;;  %v907_v39 = vld [vmem:[#allocation2 + $0x160] sm:$0xf]  ;;  %v1326_v40 = vrot.slane %v1303_v21, %v1325_v37 }
 0x148   : > { %649 = vst [vmem:[#allocation2 + $0xe0] sm:$0xf0] %v629_v26  ;;  %650 = vst [vmem:[#allocation2 + $0xe8] sm:$0xf0] %v630_v46  ;;  %1691 = vmatprep.subr.msk.mxu0 %vm917_vm8, %v908_v47  ;;  %v1330_v41 = vrot.slane %v1303_v21, %v1329_v9 }
 0x149   : > { %1692 = vmatpush1.msk.msra.mxu0 %vm917_vm8, %v907_v39  ;;  %v1333_v39 = vsub.s32 6, %v1308_v19 }
 0x14a   : > { %v689_v53 = vpop.permute.xlu1 %688  ;;  %v687_v42 = vpop.permute.xlu0 %686  ;;  %1744 = vmatprep.subr.bf16.mxu0 %v1743_v49  ;;  %1693 = vmatmul.mubr.msk.f32.vlgmr.msra.gmra.mrb[2].mxu0 %vm913_vm9, %v2395_v11 }
 0x14b   : > { %v699_v38 = vsel %vm690_vm5, %v685_v20, %v687_v42  ;;  %v700_v54 = vsel %vm690_vm5, %v687_v42, %v689_v53  ;;  %1746 = vmatpush1.bf16.msra.mxu0 %v1745_v52  ;;  %1296 = vmatprep.mubr.f32.mxu0 %v1942_v14  ;;  %v1309_v20 = vsub.s32 0, %v1308_v19  ;;  %v1334_v49 = vrot.slane %v1303_v21, %v1333_v39  ;;  %v1304_v52 = vld [vmem:[%s2561_s5 + $0x8] sm:$0x3] }
 0x14c   : > { %719 = vst [vmem:[#allocation2 + $0x130] sm:$0xf] %v699_v38  ;;  %720 = vst [vmem:[#allocation2 + $0x138] sm:$0xf] %v700_v54 }
 0x14d   : > { %v1310_v51 = vrot.slane %v1303_v21, %v1309_v20  ;;  %v1342_v54 = vrot.slane %v1304_v52, %v1309_v20 }
 0x14e   : > { %v760_v55 = vpop.permute.xlu1 %759  ;;  %v758_v56 = vpop.permute.xlu0 %757 }
 0x14f   : > { %v770_v48 = vsel %vm761_vm6, %v756_v24, %v758_v56  ;;  %v771_v58 = vsel %vm761_vm6, %v758_v56, %v760_v55  ;;  %v892_v0 = vld [vmem:[#allocation2 + $0xe8] sm:$0xff]  ;;  %v891_v4 = vld [vmem:[#allocation2 + $0xe0] sm:$0xff]  ;;  %v1314_v24 = vrot.slane %v1303_v21, %v1313_v23  ;;  %v1346_v56 = vrot.slane %v1304_v52, %v1313_v23 }
 0x150   : > { %790 = vst [vmem:[#allocation2 + $0x130] sm:$0xf0] %v770_v48  ;;  %791 = vst [vmem:[#allocation2 + $0x138] sm:$0xf0] %v771_v58 }
 0x152   : > { %v826_v59 = vpop.permute.xlu1 %825  ;;  %v824_v57 = vpop.permute.xlu0 %823 }
 0x153   : > { %v838_v60 = vsel %vm831_vm7, %v822_v6, %v824_v57  ;;  %v839_v61 = vsel %vm831_vm7, %v824_v57, %v826_v59 }
 0x154   : > { %858 = vst [vmem:[#allocation2 + $0x170] sm:$0xf] %v838_v60  ;;  %859 = vst [vmem:[#allocation2 + $0x178] sm:$0xf] %v839_v61 }
 0x156   : > { %v830_v62 = vpop.permute.xlu1 %829  ;;  %v828_v63 = vpop.permute.xlu0 %827 }
 0x157   : > { %v840_v1 = vsel %vm831_vm7, %v826_v59, %v828_v63  ;;  %v841_v2 = vsel %vm831_vm7, %v828_v63, %v830_v62  ;;  %v902_v3 = vld [vmem:[#allocation2 + $0x138] sm:$0xff]  ;;  %v901_v5 = vld [vmem:[#allocation2 + $0x130] sm:$0xff] }
 0x158   : > { %860 = vst [vmem:[#allocation2 + $0x180] sm:$0xf] %v840_v1  ;;  %861 = vst [vmem:[#allocation2 + $0x188] sm:$0xf] %v841_v2  ;;  %v1747_v10 = vpack.c.bf16 %v902_v3, %v892_v0  ;;  %v1749_v12 = vpack.c.bf16 %v901_v5, %v891_v4  ;;  %v1434_v0 = vld [vmem:[%s2558_s2] sm:$0xff]  ;;  %v1943_v1 = vmov 0  }
 0x159   : > { %1813 = vset.pattern.permute.xlu0 %v1943_v1  ;;  %1814 = vset.pattern.permute.xlu1 %v1943_v1 }
 0x15a   : > { %1748 = vmatprep.subr.bf16.mxu0 %v1747_v10 }
 0x15b   : > { %1750 = vmatpush1.bf16.msra.mxu0 %v1749_v12  ;;  %v910_v13 = vld [vmem:[#allocation2 + $0x178] sm:$0xf]  ;;  %v909_v15 = vld [vmem:[#allocation2 + $0x170] sm:$0xf] }
 0x15c   : > { %1694 = vmatprep.subr.msk.mxu1 %vm917_vm8, %v910_v13 }
 0x15d   : > { %1695 = vmatpush1.msk.msra.mxu1 %vm917_vm8, %v909_v15 }
 0x15e   : > { %1696 = vmatmul.mubr.msk.f32.vlgmr.msra.gmra.mrb[2].mxu1 %vm913_vm9, %v2395_v11  ;;  %1706 = vmatprep.subr.mxu1 %v1942_v14 }
 0x15f   : > { %v912_v17 = vld [vmem:[#allocation2 + $0x188] sm:$0xf]  ;;  %v911_v18 = vld [vmem:[#allocation2 + $0x180] sm:$0xf]  ;;  %1708 = vmatprep.mubr.msk.f32.mxu1 %vm1944_vm10, %v1942_v14 }
 0x160   : > { %1697 = vmatprep.subr.msk.mxu0 %vm917_vm8, %v912_v17 }
 0x161   : > { %1698 = vmatpush1.msk.msra.mxu0 %vm917_vm8, %v911_v18 }
 0x162   : > { %1699 = vmatmul.mubr.msk.f32.vlgmr.msra.gmra.mrb[4].mxu0 %vm913_vm9, %v2395_v11 }
 0x1dd   : > { %v1014_v25 = vpop.f32.mrb[0].mxu0 }
 0x1de   : > { %v1357_v28 = vmul.f32 %v1310_v51, %v1014_v25  ;;  %v1016_v7 = vpop.f32.mrb[1].mxu0 }
 0x1df   : > { %v1358_v6 = vmul.f32 %v1314_v24, %v1016_v7 }
 0x1e1   : > { %v1367_v8 = vadd.f32 %v1358_v6, %v1357_v28 }
 0x1fd   : > { %v1085_v11 = vpop.f32.mrb[0].mxu1 }
 0x1fe   : > { %v1359_v33 = vmul.f32 %v1318_v31, %v1085_v11  ;;  %v1087_v34 = vpop.f32.mrb[1].mxu1 }
 0x1ff   : > { %v1360_v27 = vmul.f32 %v1322_v32, %v1087_v34 }
 0x200   : > { %v1368_v35 = vadd.f32 %v1367_v8, %v1359_v33 }
 0x202   : > { %v1369_v36 = vadd.f32 %v1368_v35, %v1360_v27 }
 0x21d   : > { %v1156_v43 = vpop.f32.mrb[2].mxu0 }
 0x21e   : > { %v1361_v44 = vmul.f32 %v1326_v40, %v1156_v43  ;;  %v1158_v45 = vpop.f32.mrb[3].mxu0 }
 0x21f   : > { %v1362_v26 = vmul.f32 %v1330_v41, %v1158_v45 }
 0x220   : > { %v1370_v46 = vadd.f32 %v1369_v36, %v1361_v44 }
 0x222   : > { %v1371_v47 = vadd.f32 %v1370_v46, %v1362_v26 }
 0x231   : > { %v1227_v53 = vpop.f32.mrb[2].mxu1 }
 0x232   : > { %v1363_v42 = vmul.f32 %v1334_v49, %v1227_v53  ;;  %v1229_v38 = vpop.f32.mrb[3].mxu1 }
 0x233   : > { %v1364_v55 = vmul.f32 %v1338_v50, %v1229_v38 }
 0x234   : > { %v1372_v48 = vadd.f32 %v1371_v47, %v1363_v42  ;;  %v1421_v47 = vld [vmem:[%s2559_s3] sm:$0xff] }
 0x235   : > { %v1298_v58 = vpop.f32.mrb[4].mxu0 }
 0x236   : > { %v1373_v59 = vadd.f32 %v1372_v48, %v1364_v55  ;;  %v1365_v57 = vmul.f32 %v1342_v54, %v1298_v58  ;;  %v1300_v60 = vpop.f32.mrb[5].mxu0 }
 0x237   : > { %v1366_v61 = vmul.f32 %v1346_v56, %v1300_v60 }
 0x238   : > { %v1374_v62 = vadd.f32 %v1373_v59, %v1365_v57 }
 0x23a   : > { %v1375_v63 = vadd.f32 %v1374_v62, %v1366_v61 }
 0x23c   : > { %1376 = vadd.xlane.f32.xlu0 %v1375_v63 }
 0x252   : > { %1437 = vperm.xlu0 %1813, %v1434_v0  }
 0x2c9   : > { %v1377_v2 = vpop.xlane.xlu0 %1376 }
 0x2ca   : > { %v1378_v3 = vmul.f32 0.0009765625, %v1377_v2 }
 0x2cc   : > { %v1379_v4 = vsub.f32 %v1014_v25, %v1378_v3  ;;  %v1380_v5 = vsub.f32 %v1016_v7, %v1378_v3  ;;  %v1381_v10 = vsub.f32 %v1085_v11, %v1378_v3  ;;  %v1382_v12 = vsub.f32 %v1087_v34, %v1378_v3 }
 0x2cd   : > { %v1383_v17 = vsub.f32 %v1156_v43, %v1378_v3  ;;  %v1384_v16 = vsub.f32 %v1158_v45, %v1378_v3  ;;  %v1385_v23 = vsub.f32 %v1227_v53, %v1378_v3  ;;  %v1386_v30 = vsub.f32 %v1229_v38, %v1378_v3 }
 0x2ce   : > { %v1389_v13 = vmul.f32 %v1379_v4, %v1310_v51  ;;  %v1390_v15 = vmul.f32 %v1380_v5, %v1314_v24  ;;  %v1391_v18 = vmul.f32 %v1381_v10, %v1318_v31  ;;  %v1392_v19 = vmul.f32 %v1382_v12, %v1322_v32 }
 0x2cf   : > { %v1393_v28 = vmul.f32 %v1383_v17, %v1326_v40  ;;  %v1394_v22 = vmul.f32 %v1384_v16, %v1330_v41  ;;  %v1387_v25 = vsub.f32 %v1298_v58, %v1378_v3  ;;  %v1395_v7 = vmul.f32 %v1385_v23, %v1334_v49 }
 0x2d0   : > { %v1399_v20 = vmul.f32 %v1389_v13, %v1389_v13  ;;  %v1400_v21 = vmul.f32 %v1390_v15, %v1390_v15  ;;  %v1401_v6 = vmul.f32 %v1391_v18, %v1391_v18  ;;  %v1402_v33 = vmul.f32 %v1392_v19, %v1392_v19 }
 0x2d1   : > { %v1403_v11 = vmul.f32 %v1393_v28, %v1393_v28  ;;  %v1388_v51 = vsub.f32 %v1300_v60, %v1378_v3  ;;  %v1396_v24 = vmul.f32 %v1386_v30, %v1338_v50  ;;  %v1404_v35 = vmul.f32 %v1394_v22, %v1394_v22  ;;  %v1438_v52 = vpop.permute.xlu0 %1437 }
 0x2d2   : > { %v1409_v8 = vadd.f32 %v1400_v21, %v1399_v20  ;;  %v1397_v36 = vmul.f32 %v1387_v25, %v1342_v54  ;;  %v1405_v32 = vmul.f32 %v1395_v7, %v1395_v7 }
 0x2d3   : > { %v1398_v9 = vmul.f32 %v1388_v51, %v1346_v56  ;;  %v1406_v43 = vmul.f32 %v1396_v24, %v1396_v24 }
 0x2d4   : > { %v1410_v27 = vadd.f32 %v1409_v8, %v1401_v6  ;;  %v1407_v44 = vmul.f32 %v1397_v36, %v1397_v36 }
 0x2d5   : > { %v1408_v26 = vmul.f32 %v1398_v9, %v1398_v9 }
 0x2d6   : > { %v1411_v34 = vadd.f32 %v1410_v27, %v1402_v33 }
 0x2d8   : > { %v1412_v31 = vadd.f32 %v1411_v34, %v1403_v11 }
 0x2da   : > { %v1413_v37 = vadd.f32 %v1412_v31, %v1404_v35 }
 0x2dc   : > { %v1414_v40 = vadd.f32 %v1413_v37, %v1405_v32 }
 0x2de   : > { %v1415_v45 = vadd.f32 %v1414_v40, %v1406_v43  ;;  %v1486_v43 = vmax.f32 %v1421_v47, 0.0 }
 0x2e0   : > { %v1416_v41 = vadd.f32 %v1415_v45, %v1407_v44  ;;  %v1487_v40 = vmul.f32 256.0, %v1486_v43 }
 0x2e2   : > { %v1417_v46 = vadd.f32 %v1416_v41, %v1408_v26  ;;  %v1490_v41 = vld [vmem:[%s2560_s4] sm:$0xff] }
 0x2e4   : > { %1418 = vadd.xlane.f32.xlu1 %v1417_v46 }
 0x2f5   : > { %1452 = vperm.xlu1 %1814, %v1421_v47  }
 0x371   : > { %v1419_v39 = vpop.xlane.xlu1 %1418 }
 0x372   : > { %v1420_v29 = vmul.f32 0.0009765625, %v1419_v39 }
 0x374   : > { %v1422_v49 = vadd.f32 1e-05, %v1420_v29 }
 0x375   : > { %v1453_v55 = vpop.permute.xlu1 %1452 }
 0x376   : > { %1829 = vrsqrt.f32 %v1422_v49 }
 0x380   : > { %v1830_v50 = vpop.eup %1829 }
 0x381   : > { %v1424_v53 = vmul.f32 %v1830_v50, %v1389_v13  ;;  %v1425_v42 = vmul.f32 %v1830_v50, %v1390_v15  ;;  %v1426_v38 = vmul.f32 %v1830_v50, %v1391_v18  ;;  %v1427_v54 = vmul.f32 %v1830_v50, %v1392_v19 }
 0x382   : > { %v1428_v56 = vmul.f32 %v1830_v50, %v1393_v28  ;;  %v1429_v57 = vmul.f32 %v1830_v50, %v1394_v22  ;;  %v1430_v63 = vmul.f32 %v1830_v50, %v1395_v7  ;;  %v1431_v4 = vmul.f32 %v1830_v50, %v1396_v24 }
 0x383   : > { %v1440_v48 = vmul.f32 %v1438_v52, %v1424_v53  ;;  %v1441_v58 = vmul.f32 %v1438_v52, %v1425_v42  ;;  %v1442_v59 = vmul.f32 %v1438_v52, %v1426_v38  ;;  %v1443_v60 = vmul.f32 %v1438_v52, %v1427_v54 }
 0x384   : > { %v1444_v0 = vmul.f32 %v1438_v52, %v1428_v56  ;;  %v1445_v5 = vmul.f32 %v1438_v52, %v1429_v57  ;;  %v1432_v12 = vmul.f32 %v1830_v50, %v1397_v36  ;;  %v1446_v13 = vmul.f32 %v1438_v52, %v1430_v63 }
 0x385   : > { %v2494_v61 = vadd.f32 %v1453_v55, %v1440_v48  ;;  %v2496_v62 = vadd.f32 %v1453_v55, %v1441_v58  ;;  %v2498_v1 = vadd.f32 %v1453_v55, %v1442_v59  ;;  %v1458_v10 = vadd.f32 %v1453_v55, %v1443_v60 }
 0x386   : > { %v1459_v15 = vadd.f32 %v1453_v55, %v1444_v0  ;;  %v1433_v16 = vmul.f32 %v1830_v50, %v1398_v9  ;;  %v1447_v19 = vmul.f32 %v1438_v52, %v1431_v4  ;;  %v1460_v20 = vadd.f32 %v1453_v55, %v1445_v5 }
 0x387   : > { %v1465_v2 = vmax.f32 %v2494_v61, 0.0  ;;  %v1466_v3 = vmax.f32 %v2496_v62, 0.0  ;;  %v1467_v17 = vmax.f32 %v2498_v1, 0.0  ;;  %v1468_v21 = vmax.f32 %v1458_v10, 0.0 }
 0x388   : > { %v1448_v28 = vmul.f32 %v1438_v52, %v1432_v12  ;;  %v1461_v6 = vadd.f32 %v1453_v55, %v1446_v13  ;;  %v1469_v8 = vmax.f32 %v1459_v15, 0.0  ;;  %v1449_v22 = vmul.f32 %v1438_v52, %v1433_v16 }
 0x389   : > { %v1475_v18 = vadd.f32 %v1466_v3, %v1465_v2  ;;  %v1462_v33 = vadd.f32 %v1453_v55, %v1447_v19  ;;  %v1470_v27 = vmax.f32 %v1460_v20, 0.0 }
 0x38a   : > { %v1463_v7 = vadd.f32 %v1453_v55, %v1448_v28  ;;  %v1471_v11 = vmax.f32 %v1461_v6, 0.0  ;;  %v1464_v51 = vadd.f32 %v1453_v55, %v1449_v22 }
 0x38b   : > { %v1476_v23 = vadd.f32 %v1475_v18, %v1467_v17  ;;  %v1472_v24 = vmax.f32 %v1462_v33, 0.0 }
 0x38c   : > { %v1473_v31 = vmax.f32 %v1463_v7, 0.0  ;;  %v1474_v32 = vmax.f32 %v1464_v51, 0.0 }
 0x38d   : > { %v1477_v30 = vadd.f32 %v1476_v23, %v1468_v21 }
 0x38f   : > { %v1478_v25 = vadd.f32 %v1477_v30, %v1469_v8 }
 0x391   : > { %v1479_v34 = vadd.f32 %v1478_v25, %v1470_v27 }
 0x393   : > { %v1480_v35 = vadd.f32 %v1479_v34, %v1471_v11 }
 0x395   : > { %v1481_v36 = vadd.f32 %v1480_v35, %v1472_v24 }
 0x397   : > { %v1482_v37 = vadd.f32 %v1481_v36, %v1473_v31 }
 0x399   : > { %v1483_v9 = vadd.f32 %v1482_v37, %v1474_v32 }
 0x39b   : > { %1484 = vadd.xlane.f32.xlu1 %v1483_v9 }
 0x428   : > { %v1485_v44 = vpop.xlane.xlu1 %1484 }
 0x429   : > { %v1488_v45 = vsub.f32 %v1485_v44, %v1487_v40 }
 0x42b   : > { %v1489_v26 = vmul.f32 0.0009765625, %v1488_v45 }
 0x42d   : > { %1707 = vmatpush3.msra.mxu1 %v1489_v26 }
 0x42e   : > { %1709 = vmatmul.mubr.msk.f32.vlgmr.msra.gmra.mrb[4].mxu1 %vm1491_vm11, %v1490_v41 }
 0x501   : > { %v1561_v46 = vpop.f32.mrb[4].mxu1 }
 0x502   : > { %v1565_v39 = vsub.f32 0.0, %v1561_v46  ;;  %v1710_v29 = vpop.f32.mrb[5].mxu1 }
 0x504   : > { %v1566_v49 = vmul.f32 1.442695, %v1565_v39 }
 0x506   : > { %1831 = vpow2.f32 %v1566_v49 }
 0x510   : > { %v1832_v14 = vpop.eup %1831 }
 0x511   : > { %v1568_v47 = vadd.f32 1.0, %v1832_v14 }
 0x513   : > { %1833 = vrcp.f32 %v1568_v47 }
 0x51d   : > { %v1834_v50 = vpop.eup %1833 }
 0x51e   : > { %1572 = vperm.xlu0 %1813, %v1834_v50  }
 0x59d   : > { %v1573_v52 = vpop.permute.xlu0 %1572 }
 0x59e   : > { %v1575_v53 = vmul.f32 %v1573_v52, %v1465_v2  ;;  %v1576_v42 = vmul.f32 %v1573_v52, %v1466_v3  ;;  %v1577_v38 = vmul.f32 %v1573_v52, %v1467_v17  ;;  %v1578_v54 = vmul.f32 %v1573_v52, %v1468_v21 }
 0x59f   : > { %v1579_v55 = vmul.f32 %v1573_v52, %v1469_v8  ;;  %v1580_v56 = vmul.f32 %v1573_v52, %v1470_v27  ;;  %v1581_v48 = vmul.f32 %v1573_v52, %v1471_v11  ;;  %v1582_v58 = vmul.f32 %v1573_v52, %v1472_v24 }
 0x5a0   : > { %v1583_v59 = vmul.f32 %v1573_v52, %v1473_v31  ;;  %v1584_v57 = vmul.f32 %v1573_v52, %v1474_v32  ;;  %1585 = vst [vmem:[%s267_s12] sm:$0xff] %v1575_v53  ;;  %1586 = vst [vmem:[%s267_s12 + $0x8] sm:$0xff] %v1576_v42 }
 0x5a1   : > { %1587 = vst [vmem:[%s267_s12 + $0x10] sm:$0xff] %v1577_v38  ;;  %1588 = vst [vmem:[%s267_s12 + $0x18] sm:$0xff] %v1578_v54 }
 0x5a2   : > { %1589 = vst [vmem:[%s267_s12 + $0x20] sm:$0xff] %v1579_v55  ;;  %1590 = vst [vmem:[%s267_s12 + $0x28] sm:$0xff] %v1580_v56 }
 0x5a3   : > { %1591 = vst [vmem:[%s267_s12 + $0x30] sm:$0xff] %v1581_v48  ;;  %1592 = vst [vmem:[%s267_s12 + $0x38] sm:$0xff] %v1582_v58 }
 0x5a4   : > { %1593 = vst [vmem:[%s267_s12 + $0x40] sm:$0xff] %v1583_v59  ;;  %1594 = vst [vmem:[%s267_s12 + $0x48] sm:$0xff] %v1584_v57 }
 0x5a5   : > { %1878 = shalt.err (!%p1875_p4)
}
 0x5a6   : > { %s1879_s20 = scalar_lea.hbm %s2512_s26, 1280  ;;  %s1883_s11 = scalar_lea.hbm %s2562_s6, 2560 }
 0x5a7   : > { %p1880_p7 = scmp.ne.s32.totalorder %s2512_s26, %s1879_s20  ;;  %p1884_p0 = scmp.lt.u32.totalorder %s2512_s26, %s2562_s6 }
 0x5a8   : > { %p1885_p1 = scmp.lt.u32.totalorder %s1883_s11, %s1879_s20  ;;  %p1887_p6 = scmp.lt.u32.totalorder %s1879_s20, %s2512_s26 }
 0x5a9   : > { %p1881_p8 = pnand %p1880_p7, %p2570_p11 }
 0x5aa   : > { %p1886_p3 = por %p1885_p1, %p1884_p0 }
 0x5ab   : > { %p1882_p9 = pneg %p1881_p8 }
 0x5ac   : > { %p1888_p12 = por %p1887_p6, %p1886_p3 }
 0x5ae   : > { %p1889_p13 = pnand %p1888_p12, %p1882_p9 }
 0x5b0   : > { %1892 = shalt.err (!%p1889_p13)
}
 0x5b1   : > { %1758 = dma.vmem_to_hbm [thread:$0]  (%p2570_p11), %s2514_s14, 1280, %s2512_s26, %s1596_s28  }
 0x5b2 PF: > { %s1622_s12 = sand.u32 1, %s1919_s21   ;;  %p2571_p5 = scmp.ne.s32.totalorder %s2566_s9, 0 }
 0x5b3   : > { %p2572_p10 = scmp.ge.s32.totalorder %s1931_s24, 2  ;;  %s1623_s25 = scalar_lea.sflag [#allocation5], %s1622_s12 }
 0x5b5   : > { %p1765_p2 = pnand %p2572_p10, %p2571_p5 }
 0x5b7   : > { %1914 = dma.done.wait (!%p1765_p2), %s1623_s25, 1280  }
 0x5b8   : > { %1916 = vsyncadd (!%p1765_p2), %s1623_s25, 4294966016  ;;  %p19_p4 = scmp.ge.s32.totalorder %s2006_s27, 4   ;;  %s2573_s21 = smov %s1923_s22 }
 0x5b9   : > { %s2574_s22 = smov %s1927_s23  ;;  %s2575_s23 = smov %s2018_s30 }
 0x5ba   : > { %s2576_s24 = smov %s2006_s27  ;;  %21 = sbr.rel (!%p19_p4) target bundleno = 5 (0x5), region = 89 }
 0x5c1   :  { %1628 = vsyncpa [#allocation4], 1 }
 0x5c2   :  { %1630 = vsyncpa [#allocation4 + $0x1], 1 }
 0x5c3   :  { %1631 = vsyncpa [#allocation5], 1 }
 0x5c4   :  { %1633 = vsyncpa [#allocation5 + $0x1], 1 }

</bundles_post_ra>
